<compile_context>
chip_gen: v7x
topology: tpu7x:2x2x1
jax: 0.10.0
libtpu: 0.0.40
codegen_flags: <defaults>
</compile_context>

<pallas_src>
import functools

import jax
import jax.numpy as jnp
from jax import lax
from jax.experimental import pallas as pl
from jax.experimental.pallas import tpu as pltpu


def _make_kernel(gb: int):
    """Kernel for one (j-tile, graph-block, batch-tile) grid step."""

    def kernel(mt_ref, mtj_ref, w_ref, b_ref, g_ref, x_ref, o_ref, coef_ref):
        # mt_ref:   (D, N)       stacked key masks, pre-transposed (M^T)
        # mtj_ref:  (TN, N)      rows [j*TN:(j+1)*TN] of M^T  (= M[:, jtile]^T)
        # w_ref:    (D, TN)      weight column tile (compute dtype)
        # b_ref:    (1, TN)      bias column tile (f32)
        # g_ref:    (Gb, N, N)   adjacency block (compute dtype)
        # x_ref:    (Gb, TB, D)  concatenated samples (compute dtype)
        # o_ref:    (Gb, TB, TN) output tile
        # coef_ref: (Gb, D, TN)  VMEM scratch: (M^T G M * W)[:, jtile] per graph
        b_tile = pl.program_id(2)

        @pl.when(b_tile == 0)
        def _():
            # Rebuild the coefficient tile only when the (j, graph-block) pair
            # changes; it is reused for every batch tile of X.
            mt = mt_ref[...]                                        # (D, N)
            mt_j = mtj_ref[...]                                     # (TN, N)
            w = w_ref[...]                                          # (D, TN)
            for gi in range(gb):                                    # unrolled
                g = g_ref[gi]                                       # (N, N)
                # G @ M[:, jtile] (contract last dims; no in-kernel transpose)
                gm_j = lax.dot_general(
                    g, mt_j, (((1,), (1,)), ((), ())),
                    preferred_element_type=jnp.float32
                ).astype(mt.dtype)                                  # (N, TN)
                # M^T @ (G @ M[:, jtile])
                masked_j = lax.dot_general(
                    mt, gm_j, (((1,), (0,)), ((), ())),
                    preferred_element_type=jnp.float32)             # (D, TN)
                # masked entries are 0/1 -> down-cast exact; multiply in
                # compute dtype (no f32 upcast of W).
                coef_ref[gi] = masked_j.astype(w.dtype) * w

        bias = b_ref[...].astype(jnp.float32)                       # (1, TN)
        for gi in range(gb):                                        # unrolled
            acc = jnp.dot(x_ref[gi], coef_ref[gi],
                          preferred_element_type=jnp.float32)       # (TB, TN)
            o_ref[gi] = (acc + bias).astype(o_ref.dtype)

    return kernel


def stacked_key_masks(shapes: dict[str, int]) -> jnp.ndarray:
    """Equivalent of TensorToTensorDictTransform.stacked_key_masks()."""
    total_dim = sum(shapes.values())
    num_nodes = len(shapes)
    masks = jnp.zeros((num_nodes, total_dim), dtype=jnp.float32)
    start = 0
    for i, (_, d) in enumerate(shapes.items()):
        masks = masks.at[i, start:start + d].set(1.0)
        start += d
    return masks


def _round_up(x: int, m: int) -> int:
    return (x + m - 1) // m * m


@functools.partial(jax.jit, static_argnames=("shapes_items", "compute_dtype"))
def functional_relationships_forward(samples, graphs, masks, weight, bias,
                                     shapes_items,
                                     compute_dtype=jnp.bfloat16):
    """samples: dict key -> [Bx, Bg, d_k]; graphs: [Bg, N, N].

    Returns dict key -> [Bx, Bg, d_k] (PyTorch convention: batch_x + batch_g
    + node_shape).  batch_f is taken empty (it folds into batch_x).
    """
    shapes = dict(shapes_items)
    x = jnp.concatenate([samples[k] for k in shapes], axis=-1)     # [Bx, Bg, D]
    out_dtype = x.dtype
    Bx, Bg, D = x.shape
    N = masks.shape[0]

    # Feature dim padded to 256 so the column tile TN never drops to 128.
    D_pad = _round_up(D, 256)
    TN = 512 if D_pad % 512 == 0 else 256

    # Batch tile: multiple of 16 (bf16 sublane packing), multiple of 128 big.
    if Bx > 112:
        TB = min(512, _round_up(Bx, 128))
    else:
        TB = _round_up(max(Bx, 8), 16)

    # Graph-block size under a conservative VMEM budget (safe for v7x 64 MiB).
    c_item = jnp.dtype(compute_dtype).itemsize
    o_item = jnp.dtype(out_dtype).itemsize

    def vmem_estimate(gb, tb):
        w_b = D_pad * TN * c_item * 2                   # W tile, double-buffered
        x_b = gb * tb * D_pad * c_item * 2              # X block
        o_b = gb * tb * TN * o_item * 2                 # output block
        c_b = gb * D_pad * TN * c_item                  # coef scratch
        m_b = (D_pad + TN) * 128 * c_item * 2           # lane-padded mask blocks
        g_b = gb * _round_up(N, 8) * 128 * c_item * 2   # graph block
        b_b = 8 * TN * 4 * 2                            # bias block
        return w_b + x_b + o_b + c_b + m_b + g_b + b_b

    VMEM_BUDGET = 40 * 1024 * 1024
    Gb = max(1, min(Bg, 8))
    while Gb > 1 and vmem_estimate(Gb, TB) > VMEM_BUDGET:
        Gb -= 1
    while TB > 16 and vmem_estimate(Gb, TB) > VMEM_BUDGET:
        TB = max(16, TB // 2)

    Bx_pad = _round_up(Bx, TB)
    Bg_pad = _round_up(Bg, Gb)

    # Graph axis leading so the graph-block grid axis maps onto it.
    x_k = jnp.transpose(x, (1, 0, 2))                              # [Bg, Bx, D]
    x_k = jnp.pad(x_k, ((0, Bg_pad - Bg), (0, Bx_pad - Bx), (0, D_pad - D)))
    x_k = x_k.astype(compute_dtype)

    # masks / graphs are 0/1 -> exact in compute dtype (bf16 MXU expansion).
    masks_t = jnp.pad(masks.T.astype(compute_dtype),
                      ((0, D_pad - D), (0, 0)))                    # (D_pad, N)
    w = jnp.pad(weight, ((0, D_pad - D), (0, D_pad - D))).astype(compute_dtype)
    b = jnp.pad(bias.astype(jnp.float32), (0, D_pad - D))[None, :]  # (1, D_pad)
    g = jnp.pad(graphs, ((0, Bg_pad - Bg), (0, 0), (0, 0))).astype(compute_dtype)

    # Grid: j-tile outermost (W/bias fetched once per j), graph-block middle,
    # batch-tile innermost (coef scratch reused across it).
    grid = (D_pad // TN, Bg_pad // Gb, Bx_pad // TB)

    out = pl.pallas_call(
        _make_kernel(Gb),
        out_shape=jax.ShapeDtypeStruct((Bg_pad, Bx_pad, D_pad), out_dtype),
        grid_spec=pltpu.PrefetchScalarGridSpec(
            num_scalar_prefetch=0,
            grid=grid,
            in_specs=[
                pl.BlockSpec((D_pad, N), lambda j, gi, bi: (0, 0)),        # M^T
                pl.BlockSpec((TN, N), lambda j, gi, bi: (j, 0)),           # M^T j-rows
                pl.BlockSpec((D_pad, TN), lambda j, gi, bi: (0, j)),       # W tile
                pl.BlockSpec((1, TN), lambda j, gi, bi: (0, j)),           # bias tile
                pl.BlockSpec((Gb, N, N), lambda j, gi, bi: (gi, 0, 0)),    # graphs
                pl.BlockSpec((Gb, TB, D_pad), lambda j, gi, bi: (gi, bi, 0)),  # X
            ],
            out_specs=pl.BlockSpec((Gb, TB, TN), lambda j, gi, bi: (gi, bi, j)),
            scratch_shapes=[pltpu.VMEM((Gb, D_pad, TN), compute_dtype)],
        ),
        compiler_params=pltpu.CompilerParams(
            dimension_semantics=("parallel", "parallel", "arbitrary"),
            vmem_limit_bytes=48 * 1024 * 1024),
    )(masks_t, masks_t, w, b, g, x_k)

    out = jnp.transpose(out, (1, 0, 2))[:Bx, :Bg, :D]              # [Bx, Bg, D]
    result = {}
    start = 0
    for key_, d in shapes.items():
        result[key_] = out[..., start:start + d]
        start += d
    return result


def _reference_forward(samples, graphs, masks, weight, bias, shapes):
    x = jnp.concatenate([samples[k] for k in shapes], axis=-1)     # [Bx, Bg, D]
    masked_graph = jnp.einsum("ji,gjk,kl->gil", masks, graphs, masks)
    out = jnp.einsum("xgi,gij->xgj", x, masked_graph * weight) + bias
    result = {}
    start = 0
    for k, d in shapes.items():
        result[k] = out[..., start:start + d]
        start += d
    return result


if __name__ == "__main__":
    def make_inputs(shapes, Bx, Bg, seed=0):
        N = len(shapes)
        D = sum(shapes.values())
        key = jax.random.PRNGKey(seed)
        k_w, k_b, k_g, k_x = jax.random.split(key, 4)
        masks = stacked_key_masks(shapes)                          # [N, D]
        weight = 0.05 * jax.random.normal(k_w, (D, D), dtype=jnp.float32)
        bias = jax.random.normal(k_b, (D,), dtype=jnp.float32)
        # Random DAG-like adjacency (strictly lower triangular) per graph.
        rand = jax.random.uniform(k_g, (Bg, N, N))
        graphs = (rand < 0.5).astype(jnp.float32) * jnp.tril(
            jnp.ones((N, N), jnp.float32), k=-1)
        xs = jax.random.split(k_x, N)
        samples = {
            k: jax.random.normal(xs[i], (Bx, Bg, d), dtype=jnp.float32)
            for i, (k, d) in enumerate(shapes.items())
        }
        return samples, graphs, masks, weight, bias

    configs = [
        # (shapes, Bx, Bg)
        ({f"x{i}": 16 for i in range(8)}, 4, 2),                 # D=128, aligned
        ({"a": 16, "b": 24, "c": 8, "d": 32, "e": 20}, 6, 3),    # D=100, padded
        ({"a": 16, "b": 24, "c": 8, "d": 32, "e": 20}, 20, 10),  # Bg pad, Gb=8
    ]

    for shapes, Bx, Bg in configs:
        samples, graphs, masks, weight, bias = make_inputs(shapes, Bx, Bg)
        ref = _reference_forward(samples, graphs, masks, weight, bias, shapes)

        for cdt, atol, rtol in ((jnp.float32, 1e-4, 1e-4),
                                (jnp.bfloat16, 5e-2, 5e-2)):
            out = functional_relationships_forward(
                samples, graphs, masks, weight, bias,
                tuple(shapes.items()), compute_dtype=cdt)
            out = jax.tree_util.tree_map(jax.block_until_ready, out)
            for k in shapes:
                assert out[k].shape == (Bx, Bg, shapes[k]), (k, out[k].shape)
                assert jnp.allclose(out[k], ref[k], atol=atol, rtol=rtol), (
                    k, cdt, float(jnp.max(jnp.abs(out[k] - ref[k]))))

    print("KERNEL_OK")
</pallas_src>

<mosaic_0001>
module attributes {stable_mosaic.version = 11 : i64} {
  func.func @kernel(%arg0: i32, %arg1: i32, %arg2: i32, %arg3: memref<256x8xf32, #tpu.memory_space<vmem>>, %arg4: memref<256x8xf32, #tpu.memory_space<vmem>>, %arg5: memref<256x256xf32, #tpu.memory_space<vmem>>, %arg6: memref<1x256xf32, #tpu.memory_space<vmem>>, %arg7: memref<2x8x8xf32, #tpu.memory_space<vmem>>, %arg8: memref<2x16x256xf32, #tpu.memory_space<vmem>>, %arg9: memref<2x16x256xf32, #tpu.memory_space<vmem>>, %arg10: memref<2x256x256xf32, #tpu.memory_space<vmem>>) attributes {dimension_semantics = [#tpu.dimension_semantics<parallel>, #tpu.dimension_semantics<parallel>, #tpu.dimension_semantics<arbitrary>], iteration_bounds = array<i64: 1, 1, 1>, scalar_prefetch = 0 : i64, scratch_operands = 1 : i64, tpu.core_type = #tpu.core_type<tc>, window_params = [{pipeline_mode = #tpu.pipeline_mode<synchronous>, transform_indices = @transform_0, window_bounds = array<i64: 256, 8>}, {transform_indices = @transform_1, window_bounds = array<i64: 256, 8>}, {transform_indices = @transform_2, window_bounds = array<i64: 256, 256>}, {transform_indices = @transform_3, window_bounds = array<i64: 1, 256>}, {transform_indices = @transform_4, window_bounds = array<i64: 2, 8, 8>}, {transform_indices = @transform_5, window_bounds = array<i64: 2, 16, 256>}, {transform_indices = @transform_6, window_bounds = array<i64: 2, 16, 256>}]} {
    %c0_i32 = arith.constant 0 : i32
    %0 = arith.cmpi eq, %arg2, %c0_i32 : i32
    %1 = arith.extui %0 : i1 to i32
    %c0_i32_0 = arith.constant 0 : i32
    %2 = arith.cmpi ne, %1, %c0_i32_0 : i32
    scf.if %2 {
      %c0_20 = arith.constant 0 : index
      %c0_21 = arith.constant 0 : index
      %24 = vector.load %arg3[%c0_20, %c0_21] : memref<256x8xf32, #tpu.memory_space<vmem>>, vector<256x8xf32>
      %c0_22 = arith.constant 0 : index
      %c0_23 = arith.constant 0 : index
      %25 = vector.load %arg4[%c0_22, %c0_23] : memref<256x8xf32, #tpu.memory_space<vmem>>, vector<256x8xf32>
      %c0_24 = arith.constant 0 : index
      %c0_25 = arith.constant 0 : index
      %26 = vector.load %arg5[%c0_24, %c0_25] : memref<256x256xf32, #tpu.memory_space<vmem>>, vector<256x256xf32>
      %c0_26 = arith.constant 0 : index
      %c0_27 = arith.constant 0 : index
      %c0_28 = arith.constant 0 : index
      %27 = vector.load %arg7[%c0_26, %c0_27, %c0_28] : memref<2x8x8xf32, #tpu.memory_space<vmem>>, vector<1x8x8xf32>
      %28 = vector.shape_cast %27 : vector<1x8x8xf32> to vector<8x8xf32>
      %cst_29 = arith.constant dense<0.000000e+00> : vector<8x256xf32>
      %29 = tpu.matmul %28, %25, %cst_29 {dimension_numbers = #tpu.dot_dimension_numbers<[1], [1], [0], [0], [0, 0, 1, 0], [], []>} : vector<8x8xf32>, vector<256x8xf32>, vector<8x256xf32> -> vector<8x256xf32>
      %cst_30 = arith.constant dense<0.000000e+00> : vector<256x256xf32>
      %30 = tpu.matmul %24, %29, %cst_30 {dimension_numbers = #tpu.dot_dimension_numbers<[1], [0], [0], [1], [0, 0, 1, 1], [], []>} : vector<256x8xf32>, vector<8x256xf32>, vector<256x256xf32> -> vector<256x256xf32>
      %31 = arith.mulf %30, %26 : vector<256x256xf32>
      %c0_31 = arith.constant 0 : index
      %c0_32 = arith.constant 0 : index
      %c0_33 = arith.constant 0 : index
      %32 = vector.load %arg10[%c0_31, %c0_32, %c0_33] : memref<2x256x256xf32, #tpu.memory_space<vmem>>, vector<1x256x256xf32>
      %33 = vector.shape_cast %32 : vector<1x256x256xf32> to vector<256x256xf32>
      %34 = vector.shape_cast %31 : vector<256x256xf32> to vector<1x256x256xf32>
      tpu.vector_store %arg10[%c0_31, %c0_32, %c0_33], %34 {strides = array<i32>} : memref<2x256x256xf32, #tpu.memory_space<vmem>>, vector<1x256x256xf32>,
      %c1_34 = arith.constant 1 : index
      %c0_35 = arith.constant 0 : index
      %c0_36 = arith.constant 0 : index
      %35 = vector.load %arg7[%c1_34, %c0_35, %c0_36] : memref<2x8x8xf32, #tpu.memory_space<vmem>>, vector<1x8x8xf32>
      %36 = vector.shape_cast %35 : vector<1x8x8xf32> to vector<8x8xf32>
      %cst_37 = arith.constant dense<0.000000e+00> : vector<8x256xf32>
      %37 = tpu.matmul %36, %25, %cst_37 {dimension_numbers = #tpu.dot_dimension_numbers<[1], [1], [0], [0], [0, 0, 1, 0], [], []>} : vector<8x8xf32>, vector<256x8xf32>, vector<8x256xf32> -> vector<8x256xf32>
      %cst_38 = arith.constant dense<0.000000e+00> : vector<256x256xf32>
      %38 = tpu.matmul %24, %37, %cst_38 {dimension_numbers = #tpu.dot_dimension_numbers<[1], [0], [0], [1], [0, 0, 1, 1], [], []>} : vector<256x8xf32>, vector<8x256xf32>, vector<256x256xf32> -> vector<256x256xf32>
      %39 = arith.mulf %38, %26 : vector<256x256xf32>
      %c1_39 = arith.constant 1 : index
      %c0_40 = arith.constant 0 : index
      %c0_41 = arith.constant 0 : index
      %40 = vector.load %arg10[%c1_39, %c0_40, %c0_41] : memref<2x256x256xf32, #tpu.memory_space<vmem>>, vector<1x256x256xf32>
      %41 = vector.shape_cast %40 : vector<1x256x256xf32> to vector<256x256xf32>
      %42 = vector.shape_cast %39 : vector<256x256xf32> to vector<1x256x256xf32>
      tpu.vector_store %arg10[%c1_39, %c0_40, %c0_41], %42 {strides = array<i32>} : memref<2x256x256xf32, #tpu.memory_space<vmem>>, vector<1x256x256xf32>,
    } else {
    }
    %c0 = arith.constant 0 : index
    %c0_1 = arith.constant 0 : index
    %3 = vector.load %arg6[%c0, %c0_1] : memref<1x256xf32, #tpu.memory_space<vmem>>, vector<1x256xf32>
    %c0_2 = arith.constant 0 : index
    %c0_3 = arith.constant 0 : index
    %c0_4 = arith.constant 0 : index
    %4 = vector.load %arg8[%c0_2, %c0_3, %c0_4] : memref<2x16x256xf32, #tpu.memory_space<vmem>>, vector<1x16x256xf32>
    %5 = vector.shape_cast %4 : vector<1x16x256xf32> to vector<16x256xf32>
    %c0_5 = arith.constant 0 : index
    %c0_6 = arith.constant 0 : index
    %c0_7 = arith.constant 0 : index
    %6 = vector.load %arg10[%c0_5, %c0_6, %c0_7] : memref<2x256x256xf32, #tpu.memory_space<vmem>>, vector<1x256x256xf32>
    %7 = vector.shape_cast %6 : vector<1x256x256xf32> to vector<256x256xf32>
    %cst = arith.constant dense<0.000000e+00> : vector<16x256xf32>
    %8 = tpu.matmul %5, %7, %cst {dimension_numbers = #tpu.dot_dimension_numbers<[1], [0], [0], [1], [0, 0, 1, 1], [], []>} : vector<16x256xf32>, vector<256x256xf32>, vector<16x256xf32> -> vector<16x256xf32>
    %9 = vector.broadcast %3 : vector<1x256xf32> to vector<16x256xf32>
    %10 = arith.addf %8, %9 : vector<16x256xf32>
    %c0_8 = arith.constant 0 : index
    %c0_9 = arith.constant 0 : index
    %c0_10 = arith.constant 0 : index
    %11 = vector.load %arg9[%c0_8, %c0_9, %c0_10] : memref<2x16x256xf32, #tpu.memory_space<vmem>>, vector<1x16x256xf32>
    %12 = vector.shape_cast %11 : vector<1x16x256xf32> to vector<16x256xf32>
    %13 = vector.shape_cast %10 : vector<16x256xf32> to vector<1x16x256xf32>
    tpu.vector_store %arg9[%c0_8, %c0_9, %c0_10], %13 {strides = array<i32>} : memref<2x16x256xf32, #tpu.memory_space<vmem>>, vector<1x16x256xf32>,
    %c1 = arith.constant 1 : index
    %c0_11 = arith.constant 0 : index
    %c0_12 = arith.constant 0 : index
    %14 = vector.load %arg8[%c1, %c0_11, %c0_12] : memref<2x16x256xf32, #tpu.memory_space<vmem>>, vector<1x16x256xf32>
    %15 = vector.shape_cast %14 : vector<1x16x256xf32> to vector<16x256xf32>
    %c1_13 = arith.constant 1 : index
    %c0_14 = arith.constant 0 : index
    %c0_15 = arith.constant 0 : index
    %16 = vector.load %arg10[%c1_13, %c0_14, %c0_15] : memref<2x256x256xf32, #tpu.memory_space<vmem>>, vector<1x256x256xf32>
    %17 = vector.shape_cast %16 : vector<1x256x256xf32> to vector<256x256xf32>
    %cst_16 = arith.constant dense<0.000000e+00> : vector<16x256xf32>
    %18 = tpu.matmul %15, %17, %cst_16 {dimension_numbers = #tpu.dot_dimension_numbers<[1], [0], [0], [1], [0, 0, 1, 1], [], []>} : vector<16x256xf32>, vector<256x256xf32>, vector<16x256xf32> -> vector<16x256xf32>
    %19 = vector.broadcast %3 : vector<1x256xf32> to vector<16x256xf32>
    %20 = arith.addf %18, %19 : vector<16x256xf32>
    %c1_17 = arith.constant 1 : index
    %c0_18 = arith.constant 0 : index
    %c0_19 = arith.constant 0 : index
    %21 = vector.load %arg9[%c1_17, %c0_18, %c0_19] : memref<2x16x256xf32, #tpu.memory_space<vmem>>, vector<1x16x256xf32>
    %22 = vector.shape_cast %21 : vector<1x16x256xf32> to vector<16x256xf32>
    %23 = vector.shape_cast %20 : vector<16x256xf32> to vector<1x16x256xf32>
    tpu.vector_store %arg9[%c1_17, %c0_18, %c0_19], %23 {strides = array<i32>} : memref<2x16x256xf32, #tpu.memory_space<vmem>>, vector<1x16x256xf32>,
    return
  }
  func.func @transform_0(%arg0: i32, %arg1: i32, %arg2: i32) -> (i32, i32) {
    %c0_i32 = arith.constant 0 : i32
    %c0_i32_0 = arith.constant 0 : i32
    %c0_i32_1 = arith.constant 0 : i32
    return %c0_i32, %c0_i32_0 : i32, i32
  }
  func.func @transform_1(%arg0: i32, %arg1: i32, %arg2: i32) -> (i32, i32) {
    %c0_i32 = arith.constant 0 : i32
    %c0_i32_0 = arith.constant 0 : i32
    return %arg0, %c0_i32 : i32, i32
  }
  func.func @transform_2(%arg0: i32, %arg1: i32, %arg2: i32) -> (i32, i32) {
    %c0_i32 = arith.constant 0 : i32
    %c0_i32_0 = arith.constant 0 : i32
    return %c0_i32, %arg0 : i32, i32
  }
  func.func @transform_3(%arg0: i32, %arg1: i32, %arg2: i32) -> (i32, i32) {
    %c0_i32 = arith.constant 0 : i32
    %c0_i32_0 = arith.constant 0 : i32
    return %c0_i32, %arg0 : i32, i32
  }
  func.func @transform_4(%arg0: i32, %arg1: i32, %arg2: i32) -> (i32, i32, i32) {
    %c0_i32 = arith.constant 0 : i32
    %c0_i32_0 = arith.constant 0 : i32
    %c0_i32_1 = arith.constant 0 : i32
    return %arg1, %c0_i32, %c0_i32_0 : i32, i32, i32
  }
  func.func @transform_5(%arg0: i32, %arg1: i32, %arg2: i32) -> (i32, i32, i32) {
    %c0_i32 = arith.constant 0 : i32
    %c0_i32_0 = arith.constant 0 : i32
    return %arg1, %arg2, %c0_i32 : i32, i32, i32
  }
  func.func @transform_6(%arg0: i32, %arg1: i32, %arg2: i32) -> (i32, i32, i32) {
    %c0_i32 = arith.constant 0 : i32
    return %arg1, %arg2, %arg0 : i32, i32, i32
  }
}

</mosaic_0001>

<bundles_post_ra>
// kernel: functional_relationships_forward.1
= control target key start
LH: loop header
LB: loop body
LE: loop exit
PB: predicated region body
PF: predicated region fallthrough
CT: control target
= control target key end

     0   :  { %vm156_vm0 = vcmask 64512   ;;  %v3322_v50 = vmov 0.0   ;;  %s3315_s1 = inlined_call_operand.vmem [shape: f32[256,8], index: 1, kind: input, shape index: {}, may-alias: {0,1}]   ;;  %s3316_s4 = inlined_call_operand.vmem [shape: f32[2,8,8], index: 4, kind: input, shape index: {}]   ;;  %s3317_s0 = inlined_call_operand.vmem [shape: f32[256,8], index: 0, kind: input, shape index: {}, may-alias: {0,1}]   ;;  %s3318_s2 = inlined_call_operand.vmem [shape: f32[256,256], index: 2, kind: input, shape index: {}]   ;;  %s3319_s5 = inlined_call_operand.vmem [shape: f32[2,16,256], index: 5, kind: input, shape index: {}]   ;;  %s3320_s3 = inlined_call_operand.vmem [shape: f32[1,256], index: 3, kind: input, shape index: {}]   ;;  %s3321_s6 = inlined_call_operand.vmem [shape: f32[2,16,256], index: 6, kind: output, shape index: {}]  }
   0x1   :  { %v75_v0 = vld [vmem:[%s3315_s1 + $0x80] sm:$0xff]  ;;  %v76_v1 = vld [vmem:[%s3315_s1 + $0x88] sm:$0xff]  ;;  %vm2097_vm1 = vmpackc.low %vm156_vm0, %vm156_vm0  ;;  %583 = vmatprep.mubr.f32.mxu1 %v3322_v50 }
   0x2   :  { %v2101_v3 = vpack.c.bf16 %v76_v1, %v75_v0  ;;  %v59_v4 = vld [vmem:[%s3315_s1] sm:$0xff]  ;;  %v60_v5 = vld [vmem:[%s3315_s1 + $0x8] sm:$0xff]  ;;  %v77_v6 = vld [vmem:[%s3315_s1 + $0x90] sm:$0xff] }
   0x3   :  { %v2112_v7 = vpack.c.bf16 %v60_v5, %v59_v4  ;;  %v78_v8 = vld [vmem:[%s3315_s1 + $0x98] sm:$0xff]  ;;  %v61_v10 = vld [vmem:[%s3315_s1 + $0x10] sm:$0xff]  ;;  %v79_v12 = vld [vmem:[%s3315_s1 + $0xa0] sm:$0xff] }
   0x4   :  { %1796 = vmatprep.subr.msk.bf16.mxu0 %vm2097_vm1, %v2101_v3  ;;  %v2120_v9 = vpack.c.bf16 %v78_v8, %v77_v6  ;;  %v62_v11 = vld [vmem:[%s3315_s1 + $0x18] sm:$0xff]  ;;  %v80_v13 = vld [vmem:[%s3315_s1 + $0xa8] sm:$0xff]  ;;  %v155_v16 = vld [vmem:[%s3316_s4] sm:$0xff] }
   0x5   :  { %1799 = vmatpush3.bf16.xpose.msk.msra.mxu0 %vm2097_vm1, %v2112_v7  ;;  %v2140_v14 = vpack.c.bf16 %v62_v11, %v61_v10  ;;  %v2142_v15 = vpack.c.bf16 %v80_v13, %v79_v12  ;;  %1758 = vmatprep.mubr.msk.f32.mxu0 %vm156_vm0, %v155_v16  ;;  %v63_v17 = vld [vmem:[%s3315_s1 + $0x20] sm:$0xff]  ;;  %v64_v18 = vld [vmem:[%s3315_s1 + $0x28] sm:$0xff]  ;;  %v81_v19 = vld [vmem:[%s3315_s1 + $0xb0] sm:$0xff] }
   0x6   :  { %1802 = vmatprep.subr.msk.bf16.mxu0 %vm2097_vm1, %v2120_v9  ;;  %v82_v20 = vld [vmem:[%s3315_s1 + $0xb8] sm:$0xff]  ;;  %v2166_v21 = vpack.c.bf16 %v64_v18, %v63_v17  ;;  %v65_v23 = vld [vmem:[%s3315_s1 + $0x30] sm:$0xff]  ;;  %v83_v25 = vld [vmem:[%s3315_s1 + $0xc0] sm:$0xff] }
   0x7   :  { %v2168_v22 = vpack.c.bf16 %v82_v20, %v81_v19  ;;  %v66_v24 = vld [vmem:[%s3315_s1 + $0x38] sm:$0xff]  ;;  %v84_v26 = vld [vmem:[%s3315_s1 + $0xc8] sm:$0xff]  ;;  %v67_v29 = vld [vmem:[%s3315_s1 + $0x40] sm:$0xff] }
   0x8   :  { %v2188_v27 = vpack.c.bf16 %v66_v24, %v65_v23  ;;  %v2190_v28 = vpack.c.bf16 %v84_v26, %v83_v25  ;;  %v68_v30 = vld [vmem:[%s3315_s1 + $0x48] sm:$0xff]  ;;  %v85_v31 = vld [vmem:[%s3315_s1 + $0xd0] sm:$0xff]  ;;  %v86_v32 = vld [vmem:[%s3315_s1 + $0xd8] sm:$0xff] }
   0x9   :  { %v2210_v33 = vpack.c.bf16 %v68_v30, %v67_v29  ;;  %v2212_v34 = vpack.c.bf16 %v86_v32, %v85_v31  ;;  %v69_v35 = vld [vmem:[%s3315_s1 + $0x50] sm:$0xff]  ;;  %v70_v36 = vld [vmem:[%s3315_s1 + $0x58] sm:$0xff]  ;;  %v87_v37 = vld [vmem:[%s3315_s1 + $0xe0] sm:$0xff] }
   0xa   :  { %v88_v38 = vld [vmem:[%s3315_s1 + $0xe8] sm:$0xff]  ;;  %v2232_v39 = vpack.c.bf16 %v70_v36, %v69_v35  ;;  %v71_v41 = vld [vmem:[%s3315_s1 + $0x60] sm:$0xff]  ;;  %v89_v43 = vld [vmem:[%s3315_s1 + $0xf0] sm:$0xff] }
   0xb   :  { %v2234_v40 = vpack.c.bf16 %v88_v38, %v87_v37  ;;  %v72_v42 = vld [vmem:[%s3315_s1 + $0x68] sm:$0xff]  ;;  %v90_v44 = vld [vmem:[%s3315_s1 + $0xf8] sm:$0xff]  ;;  %v73_v47 = vld [vmem:[%s3315_s1 + $0x70] sm:$0xff] }
   0xc   :  { %v2254_v45 = vpack.c.bf16 %v72_v42, %v71_v41  ;;  %v2256_v46 = vpack.c.bf16 %v90_v44, %v89_v43  ;;  %v74_v48 = vld [vmem:[%s3315_s1 + $0x78] sm:$0xff]  ;;  %v2281_v53 = vld [vmem:[%s3317_s0] sm:$0xff]  ;;  %v2297_v55 = vld [vmem:[%s3317_s0 + $0x8] sm:$0xff] }
   0xd   :  { %1805 = vmatpush3.bf16.xpose.msk.msra.mxu0 %vm2097_vm1, %v2140_v14  ;;  %v2270_v49 = vpack.c.bf16 %v74_v48, %v73_v47  ;;  %v2286_v54 = vld [vmem:[%s3317_s0 + $0x80] sm:$0xff]  ;;  %v2302_v56 = vld [vmem:[%s3317_s0 + $0x88] sm:$0xff]  ;;  %v2316_v57 = vld [vmem:[%s3317_s0 + $0x10] sm:$0xff] }
   0xe   :  { %1808 = vmatprep.subr.msk.bf16.mxu0 %vm2097_vm1, %v2142_v15  ;;  %3403 = vst [vmem:[#allocation3_spill] sm:$0xff] %v2286_v54  ;;  %3404 = vst [vmem:[#allocation4_spill] sm:$0xff] %v2302_v56  ;;  %v2321_v58 = vld [vmem:[%s3317_s0 + $0x90] sm:$0xff]  ;;  %v2338_v59 = vld [vmem:[%s3317_s0 + $0x18] sm:$0xff] }
   0xf   :  { %3405 = vst [vmem:[#allocation5_spill] sm:$0xff] %v2321_v58  ;;  %v2343_v60 = vld [vmem:[%s3317_s0 + $0x98] sm:$0xff]  ;;  %v2354_v61 = vld [vmem:[%s3317_s0 + $0x20] sm:$0xff]  ;;  %v2376_v63 = vld [vmem:[%s3317_s0 + $0x28] sm:$0xff] }
  0x10   :  { %3406 = vst [vmem:[#allocation6_spill] sm:$0xff] %v2343_v60  ;;  %v2359_v62 = vld [vmem:[%s3317_s0 + $0xa0] sm:$0xff]  ;;  %v2381_v0 = vld [vmem:[%s3317_s0 + $0xa8] sm:$0xff]  ;;  %v2392_v1 = vld [vmem:[%s3317_s0 + $0x30] sm:$0xff] }
  0x11   :  { %3407 = vst [vmem:[#allocation7_spill] sm:$0xff] %v2359_v62  ;;  %3408 = vst [vmem:[#allocation8_spill] sm:$0xff] %v2381_v0  ;;  %v2414_v4 = vld [vmem:[%s3317_s0 + $0x38] sm:$0xff]  ;;  %v2430_v6 = vld [vmem:[%s3317_s0 + $0x40] sm:$0xff] }
  0x12   :  { %v2419_v5 = vld [vmem:[%s3317_s0 + $0xb8] sm:$0xff]  ;;  %v2452_v8 = vld [vmem:[%s3317_s0 + $0x48] sm:$0xff]  ;;  %v2468_v10 = vld [vmem:[%s3317_s0 + $0x50] sm:$0xff] }
  0x13   :  { %3410 = vst [vmem:[#allocation10_spill] sm:$0xff] %v2419_v5  ;;  %v2473_v11 = vld [vmem:[%s3317_s0 + $0xd0] sm:$0xff]  ;;  %v2490_v12 = vld [vmem:[%s3317_s0 + $0x58] sm:$0xff]  ;;  %v2533_v17 = vld [vmem:[%s3317_s0 + $0xe8] sm:$0xff] }
  0x14   :  { %3413 = vst [vmem:[#allocation13_spill] sm:$0xff] %v2473_v11  ;;  %v2495_v13 = vld [vmem:[%s3317_s0 + $0xd8] sm:$0xff]  ;;  %3417 = vst [vmem:[#allocation17_spill] sm:$0xff] %v2533_v17  ;;  %v2544_v18 = vld [vmem:[%s3317_s0 + $0x70] sm:$0xff] }
  0x15   :  { %1811 = vmatpush3.bf16.xpose.msk.msra.mxu0 %vm2097_vm1, %v2166_v21  ;;  %3414 = vst [vmem:[#allocation14_spill] sm:$0xff] %v2495_v13  ;;  %3418 = vst [vmem:[#allocation18_spill] sm:$0xff] %v2544_v18  ;;  %v2549_v19 = vld [vmem:[%s3317_s0 + $0xf0] sm:$0xff]  ;;  %v2566_v20 = vld [vmem:[%s3317_s0 + $0x78] sm:$0xff] }
  0x16   :  { %1814 = vmatprep.subr.msk.bf16.mxu0 %vm2097_vm1, %v2168_v22  ;;  %3419 = vst [vmem:[#allocation19_spill] sm:$0xff] %v2549_v19  ;;  %3420 = vst [vmem:[#allocation20_spill] sm:$0xff] %v2566_v20  ;;  %v2589_v23 = vld [vmem:[%s3318_s2 + $0x100] sm:$0xff]  ;;  %v2599_v2 = vld [vmem:[%s3318_s2 + $0x108] sm:$0xff] }
  0x17   :  { %3422 = vst [vmem:[#allocation22_spill] sm:$0xff] %v2589_v23  ;;  %v2594_v25 = vld [vmem:[%s3318_s2] sm:$0xff]  ;;  %3424 = vst [vmem:[#allocation24_spill] sm:$0xff] %v2599_v2  ;;  %v2609_v30 = vld [vmem:[%s3318_s2 + $0x110] sm:$0xff] }
  0x18   :  { %3423 = vst [vmem:[#allocation23_spill] sm:$0xff] %v2594_v25  ;;  %3426 = vst [vmem:[#allocation26_spill] sm:$0xff] %v2609_v30  ;;  %v2614_v31 = vld [vmem:[%s3318_s2 + $0x10] sm:$0xff]  ;;  %v2628_v35 = vld [vmem:[%s3318_s2 + $0x18] sm:$0xff] }
  0x19   :  { %3427 = vst [vmem:[#allocation27_spill] sm:$0xff] %v2614_v31  ;;  %3429 = vst [vmem:[#allocation29_spill] sm:$0xff] %v2628_v35 }
  0x1d   :  { %1817 = vmatpush3.bf16.xpose.msk.msra.mxu0 %vm2097_vm1, %v2188_v27 }
  0x1e   :  { %1820 = vmatprep.subr.msk.bf16.mxu0 %vm2097_vm1, %v2190_v28 }
  0x25   :  { %1823 = vmatpush3.bf16.xpose.msk.msra.mxu0 %vm2097_vm1, %v2210_v33 }
  0x26   :  { %1826 = vmatprep.subr.msk.bf16.mxu0 %vm2097_vm1, %v2212_v34 }
  0x2d   :  { %1829 = vmatpush3.bf16.xpose.msk.msra.mxu0 %vm2097_vm1, %v2232_v39 }
  0x2e   :  { %1832 = vmatprep.subr.msk.bf16.mxu0 %vm2097_vm1, %v2234_v40 }
  0x35   :  { %1835 = vmatpush3.bf16.xpose.msk.msra.mxu0 %vm2097_vm1, %v2254_v45 }
  0x36   :  { %1838 = vmatprep.subr.msk.bf16.mxu0 %vm2097_vm1, %v2256_v46 }
  0x3d   :  { %1841 = vmatpush3.bf16.xpose.msk.msra.mxu0 %vm2097_vm1, %v2270_v49 }
  0x44   :  { %1759 = vmatmul.mubr.msk.f32.vlgmr.msra.gmra.mrb[0].mxu0 %vm156_vm0, %v155_v16  ;;  %v2528_v16 = vld [vmem:[%s3317_s0 + $0x68] sm:$0xff] }
  0x45   :  { %487 = vmatprep.mubr.f32.mxu0 %v3322_v50  ;;  %3416 = vst [vmem:[#allocation16_spill] sm:$0xff] %v2528_v16 }
 0x117   :  { %v322_v51 = vpop.f32.mrb[0].mxu0 }
 0x118   :  { %v324_v52 = vpop.f32.mrb[1].mxu0 }
 0x119   :  { %423 = vmatprep.subr.mxu0 %v324_v52  ;;  %2018 = vmatprep.subr.mxu1 %v324_v52 }
 0x11a   :  { %424 = vmatpush1.msra.mxu0 %v322_v51  ;;  %2019 = vmatpush1.msra.mxu1 %v322_v51 }
 0x11b   :  { %1620 = vmatmul.mubr.msk.f32.vlgmr.msra.gmra.mrb[2].mxu0 %vm156_vm0, %v2281_v53  ;;  %1636 = vmatmul.mubr.msk.f32.vlgmr.msra.gmra.mrb[0].mxu1 %vm156_vm0, %v2286_v54 }
 0x11c   :  { %493 = vmatprep.mubr.f32.mxu0 %v3322_v50  ;;  %589 = vmatprep.mubr.f32.mxu1 %v3322_v50 }
 0x11d   :  { %1844 = vmatprep.subr.msk.bf16.mxu1 %vm2097_vm1, %v2101_v3  ;;  %v2397_v3 = vld [vmem:[%s3317_s0 + $0xb0] sm:$0xff] }
 0x11e   :  { %3409 = vst [vmem:[#allocation9_spill] sm:$0xff] %v2397_v3 }
 0x11f   :  { %1621 = vmatmul.mubr.msk.f32.gmra.mrb[4].mxu0 %vm156_vm0, %v2297_v55  ;;  %1637 = vmatmul.mubr.msk.f32.gmra.mrb[2].mxu1 %vm156_vm0, %v2302_v56 }
 0x120   :  { %499 = vmatprep.mubr.f32.mxu0 %v3322_v50  ;;  %595 = vmatprep.mubr.f32.mxu1 %v3322_v50 }
 0x121   :  { %1847 = vmatpush3.bf16.xpose.msk.msra.mxu1 %vm2097_vm1, %v2112_v7  ;;  %v2435_v7 = vld [vmem:[%s3317_s0 + $0xc0] sm:$0xff] }
 0x122   :  { %1850 = vmatprep.subr.msk.bf16.mxu1 %vm2097_vm1, %v2120_v9  ;;  %3411 = vst [vmem:[#allocation11_spill] sm:$0xff] %v2435_v7  ;;  %v2457_v9 = vld [vmem:[%s3317_s0 + $0xc8] sm:$0xff] }
 0x123   :  { %1622 = vmatmul.mubr.msk.f32.gmra.mrb[6].mxu0 %vm156_vm0, %v2316_v57  ;;  %1638 = vmatmul.mubr.msk.f32.gmra.mrb[4].mxu1 %vm156_vm0, %v2321_v58  ;;  %3412 = vst [vmem:[#allocation12_spill] sm:$0xff] %v2457_v9 }
 0x124   :  { %505 = vmatprep.mubr.f32.mxu0 %v3322_v50  ;;  %601 = vmatprep.mubr.f32.mxu1 %v3322_v50 }
 0x127   :  { %1623 = vmatmul.mubr.msk.f32.gmra.mrb[8].mxu0 %vm156_vm0, %v2338_v59  ;;  %1639 = vmatmul.mubr.msk.f32.gmra.mrb[6].mxu1 %vm156_vm0, %v2343_v60 }
 0x128   :  { %511 = vmatprep.mubr.f32.mxu0 %v3322_v50  ;;  %607 = vmatprep.mubr.f32.mxu1 %v3322_v50 }
 0x129   :  { %1853 = vmatpush3.bf16.xpose.msk.msra.mxu1 %vm2097_vm1, %v2140_v14  ;;  %v2506_v14 = vld [vmem:[%s3317_s0 + $0x60] sm:$0xff] }
 0x12a   :  { %1856 = vmatprep.subr.msk.bf16.mxu1 %vm2097_vm1, %v2142_v15  ;;  %v2511_v15 = vld [vmem:[%s3317_s0 + $0xe0] sm:$0xff] }
 0x12b   :  { %1624 = vmatmul.mubr.msk.f32.gmra.mrb[10].mxu0 %vm156_vm0, %v2354_v61  ;;  %1640 = vmatmul.mubr.msk.f32.gmra.mrb[8].mxu1 %vm156_vm0, %v2359_v62  ;;  %3415 = vst [vmem:[#allocation15_spill] sm:$0xff] %v2511_v15 }
 0x12c   :  { %517 = vmatprep.mubr.f32.mxu0 %v3322_v50  ;;  %613 = vmatprep.mubr.f32.mxu1 %v3322_v50 }
 0x12f   :  { %1625 = vmatmul.mubr.msk.f32.gmra.mrb[12].mxu0 %vm156_vm0, %v2376_v63  ;;  %1641 = vmatmul.mubr.msk.f32.gmra.mrb[10].mxu1 %vm156_vm0, %v2381_v0 }
 0x130   :  { %523 = vmatprep.mubr.f32.mxu0 %v3322_v50  ;;  %619 = vmatprep.mubr.f32.mxu1 %v3322_v50 }
 0x131   :  { %1859 = vmatpush3.bf16.xpose.msk.msra.mxu1 %vm2097_vm1, %v2166_v21  ;;  %v2571_v21 = vld [vmem:[%s3317_s0 + $0xf8] sm:$0xff] }
 0x132   :  { %1862 = vmatprep.subr.msk.bf16.mxu1 %vm2097_vm1, %v2168_v22  ;;  %3421 = vst [vmem:[#allocation21_spill] sm:$0xff] %v2571_v21  ;;  %v1652_v22 = vld [vmem:[%s3316_s4 + $0x8] sm:$0xff] }
 0x133   :  { %1626 = vmatmul.mubr.msk.f32.gmra.mrb[14].mxu0 %vm156_vm0, %v2392_v1  ;;  %1642 = vmatmul.mubr.msk.f32.gmra.mrb[12].mxu1 %vm156_vm0, %v2397_v3 }
 0x134   :  { %529 = vmatprep.mubr.f32.mxu0 %v3322_v50  ;;  %625 = vmatprep.mubr.f32.mxu1 %v3322_v50 }
 0x137   :  { %1627 = vmatmul.mubr.msk.f32.gmra.mrb[16].mxu0 %vm156_vm0, %v2414_v4  ;;  %1643 = vmatmul.mubr.msk.f32.gmra.mrb[14].mxu1 %vm156_vm0, %v2419_v5 }
 0x138   :  { %535 = vmatprep.mubr.f32.mxu0 %v3322_v50  ;;  %631 = vmatprep.mubr.f32.mxu1 %v3322_v50 }
 0x139   :  { %1865 = vmatpush3.bf16.xpose.msk.msra.mxu1 %vm2097_vm1, %v2188_v27 }
 0x13a   :  { %1868 = vmatprep.subr.msk.bf16.mxu1 %vm2097_vm1, %v2190_v28  ;;  %v2604_v28 = vld [vmem:[%s3318_s2 + $0x8] sm:$0xff] }
 0x13b   :  { %1628 = vmatmul.mubr.msk.f32.gmra.mrb[18].mxu0 %vm156_vm0, %v2430_v6  ;;  %1644 = vmatmul.mubr.msk.f32.gmra.mrb[16].mxu1 %vm156_vm0, %v2435_v7  ;;  %3425 = vst [vmem:[#allocation25_spill] sm:$0xff] %v2604_v28 }
 0x13c   :  { %541 = vmatprep.mubr.f32.mxu0 %v3322_v50  ;;  %637 = vmatprep.mubr.f32.mxu1 %v3322_v50 }
 0x13f   :  { %1629 = vmatmul.mubr.msk.f32.gmra.mrb[20].mxu0 %vm156_vm0, %v2452_v8  ;;  %1645 = vmatmul.mubr.msk.f32.gmra.mrb[18].mxu1 %vm156_vm0, %v2457_v9 }
 0x140   :  { %547 = vmatprep.mubr.f32.mxu0 %v3322_v50  ;;  %643 = vmatprep.mubr.f32.mxu1 %v3322_v50 }
 0x141   :  { %1871 = vmatpush3.bf16.xpose.msk.msra.mxu1 %vm2097_vm1, %v2210_v33  ;;  %v2622_v33 = vld [vmem:[%s3318_s2 + $0x118] sm:$0xff] }
 0x142   :  { %1874 = vmatprep.subr.msk.bf16.mxu1 %vm2097_vm1, %v2212_v34  ;;  %3428 = vst [vmem:[#allocation28_spill] sm:$0xff] %v2622_v33 }
 0x143   :  { %1630 = vmatmul.mubr.msk.f32.gmra.mrb[22].mxu0 %vm156_vm0, %v2468_v10  ;;  %1646 = vmatmul.mubr.msk.f32.gmra.mrb[20].mxu1 %vm156_vm0, %v2473_v11 }
 0x144   :  { %553 = vmatprep.mubr.f32.mxu0 %v3322_v50  ;;  %649 = vmatprep.mubr.f32.mxu1 %v3322_v50 }
 0x147   :  { %1631 = vmatmul.mubr.msk.f32.gmra.mrb[24].mxu0 %vm156_vm0, %v2490_v12  ;;  %1647 = vmatmul.mubr.msk.f32.gmra.mrb[22].mxu1 %vm156_vm0, %v2495_v13 }
 0x148   :  { %559 = vmatprep.mubr.f32.mxu0 %v3322_v50  ;;  %655 = vmatprep.mubr.f32.mxu1 %v3322_v50 }
 0x149   :  { %1877 = vmatpush3.bf16.xpose.msk.msra.mxu1 %vm2097_vm1, %v2232_v39 }
 0x14a   :  { %1880 = vmatprep.subr.msk.bf16.mxu1 %vm2097_vm1, %v2234_v40 }
 0x14b   :  { %1632 = vmatmul.mubr.msk.f32.gmra.mrb[26].mxu0 %vm156_vm0, %v2506_v14  ;;  %1648 = vmatmul.mubr.msk.f32.gmra.mrb[24].mxu1 %vm156_vm0, %v2511_v15 }
 0x14c   :  { %565 = vmatprep.mubr.f32.mxu0 %v3322_v50  ;;  %661 = vmatprep.mubr.f32.mxu1 %v3322_v50 }
 0x14f   :  { %1633 = vmatmul.mubr.msk.f32.gmra.mrb[28].mxu0 %vm156_vm0, %v2528_v16  ;;  %1649 = vmatmul.mubr.msk.f32.gmra.mrb[26].mxu1 %vm156_vm0, %v2533_v17 }
 0x150   :  { %571 = vmatprep.mubr.f32.mxu0 %v3322_v50  ;;  %667 = vmatprep.mubr.f32.mxu1 %v3322_v50 }
 0x151   :  { %1883 = vmatpush3.bf16.xpose.msk.msra.mxu1 %vm2097_vm1, %v2254_v45 }
 0x152   :  { %1886 = vmatprep.subr.msk.bf16.mxu1 %vm2097_vm1, %v2256_v46 }
 0x153   :  { %1634 = vmatmul.mubr.msk.f32.gmra.mrb[30].mxu0 %vm156_vm0, %v2544_v18  ;;  %1650 = vmatmul.mubr.msk.f32.gmra.mrb[28].mxu1 %vm156_vm0, %v2549_v19 }
 0x154   :  { %577 = vmatprep.mubr.f32.mxu0 %v3322_v50  ;;  %673 = vmatprep.mubr.f32.mxu1 %v3322_v50 }
 0x157   :  { %1635 = vmatmul.mubr.msk.f32.gmra.mrb[32].mxu0 %vm156_vm0, %v2566_v20  ;;  %1651 = vmatmul.mubr.msk.f32.gmra.mrb[30].mxu1 %vm156_vm0, %v2571_v21 }
 0x158   :  { %1792 = vmatprep.mubr.msk.f32.mxu1 %vm156_vm0, %v1652_v22 }
 0x159   :  { %1889 = vmatpush3.bf16.xpose.msk.msra.mxu1 %vm2097_vm1, %v2270_v49  ;;  %v2649_v49 = vld [vmem:[%s3318_s2 + $0x120] sm:$0xff] }
 0x15a   :  { %3430 = vst [vmem:[#allocation30_spill] sm:$0xff] %v2649_v49 }
 0x160   :  { %1793 = vmatmul.mubr.msk.f32.vlgmr.msra.gmra.mrb[32].mxu1 %vm156_vm0, %v1652_v22  ;;  %v2654_v22 = vld [vmem:[%s3318_s2 + $0x20] sm:$0xff] }
 0x161   :  { %948 = vmatprep.mubr.f32.mxu1 %v3322_v50  ;;  %3431 = vst [vmem:[#allocation31_spill] sm:$0xff] %v2654_v22 }
 0x1ee   :  { %v585_v24 = vpop.f32.mrb[0].mxu1  ;;  %v489_v26 = vpop.f32.mrb[2].mxu0 }
 0x1ef   :  { %v587_v27 = vpop.f32.mrb[1].mxu1  ;;  %v491_v29 = vpop.f32.mrb[3].mxu0  ;;  %v2617_v32 = vmul.f32 %v585_v24, %v2589_v23  ;;  %v680_v34 = vmul.f32 %v489_v26, %v2594_v25  ;;  %v2659_v26 = vld [vmem:[%s3318_s2 + $0x128] sm:$0xff]  ;;  %v2748_v23 = vld [vmem:[%s3318_s2 + $0x58] sm:$0xff] }
 0x1f0   :  { %v2631_v36 = vmul.f32 %v587_v27, %v2599_v2  ;;  %v681_v38 = vmul.f32 %v491_v29, %v2604_v28  ;;  %3432 = vst [vmem:[#allocation32_spill] sm:$0xff] %v2659_v26  ;;  %v2664_v29 = vld [vmem:[%s3318_s2 + $0x28] sm:$0xff]  ;;  %3445 = vst [vmem:[#allocation45_spill] sm:$0xff] %v2748_v23 }
 0x1f1   :  { %3433 = vst [vmem:[#allocation33_spill] sm:$0xff] %v2664_v29 }
 0x1f2   :  { %v591_v37 = vpop.f32.mrb[2].mxu1  ;;  %v495_v39 = vpop.f32.mrb[4].mxu0 }
 0x1f3   :  { %v2635_v40 = vmul.f32 %v591_v37, %v2609_v30  ;;  %v593_v41 = vpop.f32.mrb[3].mxu1  ;;  %v682_v42 = vmul.f32 %v495_v39, %v2614_v31  ;;  %v497_v43 = vpop.f32.mrb[5].mxu0  ;;  %v2669_v37 = vld [vmem:[%s3318_s2 + $0x130] sm:$0xff] }
 0x1f4   :  { %v2639_v44 = vmul.f32 %v593_v41, %v2622_v33  ;;  %v683_v45 = vmul.f32 %v497_v43, %v2628_v35  ;;  %3434 = vst [vmem:[#allocation34_spill] sm:$0xff] %v2669_v37  ;;  %v2682_v41 = vld [vmem:[%s3318_s2 + $0x138] sm:$0xff] }
 0x1f5   :  { %v1892_v47 = vpack.c.bf16 %v682_v42, %v680_v34  ;;  %3436 = vst [vmem:[#allocation36_spill] sm:$0xff] %v2682_v41  ;;  %v2688_v43 = vld [vmem:[%s3318_s2 + $0x38] sm:$0xff] }
 0x1f6   :  { %v597_v51 = vpop.f32.mrb[4].mxu1  ;;  %v1890_v52 = vpack.c.bf16 %v683_v45, %v681_v38  ;;  %v501_v24 = vpop.f32.mrb[6].mxu0  ;;  %v2674_v38 = vld [vmem:[%s3318_s2 + $0x30] sm:$0xff]  ;;  %3437 = vst [vmem:[#allocation37_spill] sm:$0xff] %v2688_v43 }
 0x1f7   :  { %v599_v27 = vpop.f32.mrb[5].mxu1  ;;  %v503_v34 = vpop.f32.mrb[7].mxu0  ;;  %3435 = vst [vmem:[#allocation35_spill] sm:$0xff] %v2674_v38  ;;  %v2677_v39 = vmul.f32 %v597_v51, %v2649_v49  ;;  %v684_v42 = vmul.f32 %v501_v24, %v2654_v22 }
 0x1f8   :  { %1891 = vmatprep.subr.bf16.mxu0 %v1890_v52  ;;  %v2691_v45 = vmul.f32 %v599_v27, %v2659_v26  ;;  %v685_v51 = vmul.f32 %v503_v34, %v2664_v29 }
 0x1f9   :  { %1893 = vmatpush1.bf16.msra.mxu0 %v1892_v47  ;;  %v2724_v47 = vld [vmem:[%s3318_s2 + $0x48] sm:$0xff] }
 0x1fa   :  { %v603_v52 = vpop.f32.mrb[6].mxu1  ;;  %v507_v50 = vpop.f32.mrb[8].mxu0  ;;  %3441 = vst [vmem:[#allocation41_spill] sm:$0xff] %v2724_v47 }
 0x1fb   :  { %v2695_v46 = vmul.f32 %v603_v52, %v2669_v37  ;;  %v605_v48 = vpop.f32.mrb[7].mxu1  ;;  %v686_v49 = vmul.f32 %v507_v50, %v2674_v38  ;;  %v509_v24 = vpop.f32.mrb[9].mxu0  ;;  %v2709_v52 = vld [vmem:[%s3318_s2 + $0x140] sm:$0xff]  ;;  %v2742_v37 = vld [vmem:[%s3318_s2 + $0x158] sm:$0xff] }
 0x1fc   :  { %v2699_v33 = vmul.f32 %v605_v48, %v2682_v41  ;;  %v687_v2 = vmul.f32 %v509_v24, %v2688_v43  ;;  %3438 = vst [vmem:[#allocation38_spill] sm:$0xff] %v2709_v52  ;;  %v2714_v48 = vld [vmem:[%s3318_s2 + $0x40] sm:$0xff]  ;;  %3444 = vst [vmem:[#allocation44_spill] sm:$0xff] %v2742_v37 }
 0x1fd   :  { %v1896_v27 = vpack.c.bf16 %v686_v49, %v684_v42  ;;  %3439 = vst [vmem:[#allocation39_spill] sm:$0xff] %v2714_v48  ;;  %v2719_v49 = vld [vmem:[%s3318_s2 + $0x148] sm:$0xff] }
 0x1fe   :  { %v609_v26 = vpop.f32.mrb[8].mxu1  ;;  %v1894_v50 = vpack.c.bf16 %v687_v2, %v685_v51  ;;  %v513_v24 = vpop.f32.mrb[10].mxu0  ;;  %3440 = vst [vmem:[#allocation40_spill] sm:$0xff] %v2719_v49  ;;  %v2729_v2 = vld [vmem:[%s3318_s2 + $0x150] sm:$0xff] }
 0x1ff   :  { %v611_v42 = vpop.f32.mrb[9].mxu1  ;;  %v515_v34 = vpop.f32.mrb[11].mxu0  ;;  %3442 = vst [vmem:[#allocation42_spill] sm:$0xff] %v2729_v2  ;;  %v2734_v51 = vld [vmem:[%s3318_s2 + $0x50] sm:$0xff]  ;;  %v2737_v41 = vmul.f32 %v609_v26, %v2709_v52  ;;  %v688_v30 = vmul.f32 %v513_v24, %v2714_v48 }
 0x200   :  { %3443 = vst [vmem:[#allocation43_spill] sm:$0xff] %v2734_v51  ;;  %1895 = vmatprep.subr.bf16.mxu0 %v1894_v50  ;;  %v2751_v43 = vmul.f32 %v611_v42, %v2719_v49  ;;  %v689_v26 = vmul.f32 %v515_v34, %v2724_v47  ;;  %v2808_v47 = vld [vmem:[%s3318_s2 + $0x78] sm:$0xff] }
 0x201   :  { %1897 = vmatpush1.bf16.msra.mxu0 %v1896_v27  ;;  %v2784_v27 = vld [vmem:[%s3318_s2 + $0x68] sm:$0xff]  ;;  %3453 = vst [vmem:[#allocation53_spill] sm:$0xff] %v2808_v47 }
 0x202   :  { %v615_v50 = vpop.f32.mrb[10].mxu1  ;;  %v519_v52 = vpop.f32.mrb[12].mxu0  ;;  %3449 = vst [vmem:[#allocation49_spill] sm:$0xff] %v2784_v27 }
 0x203   :  { %v2755_v29 = vmul.f32 %v615_v50, %v2729_v2  ;;  %v617_v38 = vpop.f32.mrb[11].mxu1  ;;  %v690_v22 = vmul.f32 %v519_v52, %v2734_v51  ;;  %v521_v24 = vpop.f32.mrb[13].mxu0  ;;  %v2769_v50 = vld [vmem:[%s3318_s2 + $0x160] sm:$0xff]  ;;  %v2802_v2 = vld [vmem:[%s3318_s2 + $0x178] sm:$0xff] }
 0x204   :  { %v2759_v48 = vmul.f32 %v617_v38, %v2742_v37  ;;  %v691_v35 = vmul.f32 %v521_v24, %v2748_v23  ;;  %3446 = vst [vmem:[#allocation46_spill] sm:$0xff] %v2769_v50  ;;  %v2774_v38 = vld [vmem:[%s3318_s2 + $0x60] sm:$0xff]  ;;  %3452 = vst [vmem:[#allocation52_spill] sm:$0xff] %v2802_v2 }
 0x205   :  { %v1900_v42 = vpack.c.bf16 %v690_v22, %v688_v30  ;;  %3447 = vst [vmem:[#allocation47_spill] sm:$0xff] %v2774_v38  ;;  %v2779_v30 = vld [vmem:[%s3318_s2 + $0x168] sm:$0xff] }
 0x206   :  { %v621_v49 = vpop.f32.mrb[12].mxu1  ;;  %v1898_v52 = vpack.c.bf16 %v691_v35, %v689_v26  ;;  %v525_v24 = vpop.f32.mrb[14].mxu0  ;;  %3448 = vst [vmem:[#allocation48_spill] sm:$0xff] %v2779_v30  ;;  %v2789_v35 = vld [vmem:[%s3318_s2 + $0x170] sm:$0xff] }
 0x207   :  { %v623_v22 = vpop.f32.mrb[13].mxu1  ;;  %v527_v34 = vpop.f32.mrb[15].mxu0  ;;  %3450 = vst [vmem:[#allocation50_spill] sm:$0xff] %v2789_v35  ;;  %v2794_v26 = vld [vmem:[%s3318_s2 + $0x70] sm:$0xff]  ;;  %v2797_v37 = vmul.f32 %v621_v49, %v2769_v50  ;;  %v692_v23 = vmul.f32 %v525_v24, %v2774_v38 }
 0x208   :  { %3451 = vst [vmem:[#allocation51_spill] sm:$0xff] %v2794_v26  ;;  %1899 = vmatprep.subr.bf16.mxu0 %v1898_v52  ;;  %v2811_v51 = vmul.f32 %v623_v22, %v2779_v30  ;;  %v693_v49 = vmul.f32 %v527_v34, %v2784_v27  ;;  %v2868_v27 = vld [vmem:[%s3318_s2 + $0x98] sm:$0xff] }
 0x209   :  { %1901 = vmatpush1.bf16.msra.mxu0 %v1900_v42  ;;  %v2844_v42 = vld [vmem:[%s3318_s2 + $0x88] sm:$0xff]  ;;  %3461 = vst [vmem:[#allocation61_spill] sm:$0xff] %v2868_v27 }
 0x20a   :  { %v627_v52 = vpop.f32.mrb[14].mxu1  ;;  %v531_v50 = vpop.f32.mrb[16].mxu0  ;;  %3457 = vst [vmem:[#allocation57_spill] sm:$0xff] %v2844_v42 }
 0x20b   :  { %v2815_v28 = vmul.f32 %v627_v52, %v2789_v35  ;;  %v629_v31 = vpop.f32.mrb[15].mxu1  ;;  %v694_v25 = vmul.f32 %v531_v50, %v2794_v26  ;;  %v533_v24 = vpop.f32.mrb[17].mxu0  ;;  %v2829_v52 = vld [vmem:[%s3318_s2 + $0x180] sm:$0xff]  ;;  %v2862_v35 = vld [vmem:[%s3318_s2 + $0x198] sm:$0xff] }
 0x20c   :  { %v2819_v38 = vmul.f32 %v629_v31, %v2802_v2  ;;  %v695_v21 = vmul.f32 %v533_v24, %v2808_v47  ;;  %3454 = vst [vmem:[#allocation54_spill] sm:$0xff] %v2829_v52  ;;  %v2834_v31 = vld [vmem:[%s3318_s2 + $0x80] sm:$0xff]  ;;  %3460 = vst [vmem:[#allocation60_spill] sm:$0xff] %v2862_v35 }
 0x20d   :  { %v1904_v22 = vpack.c.bf16 %v694_v25, %v692_v23  ;;  %3455 = vst [vmem:[#allocation55_spill] sm:$0xff] %v2834_v31  ;;  %v2839_v23 = vld [vmem:[%s3318_s2 + $0x188] sm:$0xff] }
 0x20e   :  { %v633_v30 = vpop.f32.mrb[16].mxu1  ;;  %v1902_v50 = vpack.c.bf16 %v695_v21, %v693_v49  ;;  %v537_v24 = vpop.f32.mrb[18].mxu0  ;;  %3456 = vst [vmem:[#allocation56_spill] sm:$0xff] %v2839_v23  ;;  %v2849_v21 = vld [vmem:[%s3318_s2 + $0x190] sm:$0xff] }
 0x20f   :  { %v635_v25 = vpop.f32.mrb[17].mxu1  ;;  %v539_v34 = vpop.f32.mrb[19].mxu0  ;;  %3458 = vst [vmem:[#allocation58_spill] sm:$0xff] %v2849_v21  ;;  %v2854_v49 = vld [vmem:[%s3318_s2 + $0x90] sm:$0xff]  ;;  %v2857_v2 = vmul.f32 %v633_v30, %v2829_v52  ;;  %v696_v47 = vmul.f32 %v537_v24, %v2834_v31 }
 0x210   :  { %3459 = vst [vmem:[#allocation59_spill] sm:$0xff] %v2854_v49  ;;  %1903 = vmatprep.subr.bf16.mxu0 %v1902_v50  ;;  %v2871_v26 = vmul.f32 %v635_v25, %v2839_v23  ;;  %v697_v30 = vmul.f32 %v539_v34, %v2844_v42  ;;  %v2928_v42 = vld [vmem:[%s3318_s2 + $0xb8] sm:$0xff] }
 0x211   :  { %1905 = vmatpush1.bf16.msra.mxu0 %v1904_v22  ;;  %v2904_v22 = vld [vmem:[%s3318_s2 + $0xa8] sm:$0xff]  ;;  %3469 = vst [vmem:[#allocation69_spill] sm:$0xff] %v2928_v42 }
 0x212   :  { %v639_v50 = vpop.f32.mrb[18].mxu1  ;;  %v543_v52 = vpop.f32.mrb[20].mxu0  ;;  %3465 = vst [vmem:[#allocation65_spill] sm:$0xff] %v2904_v22 }
 0x213   :  { %v2875_v19 = vmul.f32 %v639_v50, %v2849_v21  ;;  %v641_v17 = vpop.f32.mrb[19].mxu1  ;;  %v698_v15 = vmul.f32 %v543_v52, %v2854_v49  ;;  %v545_v24 = vpop.f32.mrb[21].mxu0  ;;  %v2889_v50 = vld [vmem:[%s3318_s2 + $0x1a0] sm:$0xff]  ;;  %v2922_v21 = vld [vmem:[%s3318_s2 + $0x1b8] sm:$0xff] }
 0x214   :  { %v2879_v31 = vmul.f32 %v641_v17, %v2862_v35  ;;  %v699_v13 = vmul.f32 %v545_v24, %v2868_v27  ;;  %3462 = vst [vmem:[#allocation62_spill] sm:$0xff] %v2889_v50  ;;  %v2894_v17 = vld [vmem:[%s3318_s2 + $0xa0] sm:$0xff]  ;;  %3468 = vst [vmem:[#allocation68_spill] sm:$0xff] %v2922_v21 }
 0x215   :  { %v1908_v25 = vpack.c.bf16 %v698_v15, %v696_v47  ;;  %3463 = vst [vmem:[#allocation63_spill] sm:$0xff] %v2894_v17  ;;  %v2899_v15 = vld [vmem:[%s3318_s2 + $0x1a8] sm:$0xff] }
 0x216   :  { %v645_v23 = vpop.f32.mrb[20].mxu1  ;;  %v1906_v52 = vpack.c.bf16 %v699_v13, %v697_v30  ;;  %v549_v24 = vpop.f32.mrb[22].mxu0  ;;  %3464 = vst [vmem:[#allocation64_spill] sm:$0xff] %v2899_v15  ;;  %v2909_v13 = vld [vmem:[%s3318_s2 + $0x1b0] sm:$0xff] }
 0x217   :  { %v647_v47 = vpop.f32.mrb[21].mxu1  ;;  %v551_v34 = vpop.f32.mrb[23].mxu0  ;;  %3466 = vst [vmem:[#allocation66_spill] sm:$0xff] %v2909_v13  ;;  %v2914_v30 = vld [vmem:[%s3318_s2 + $0xb0] sm:$0xff]  ;;  %v2917_v35 = vmul.f32 %v645_v23, %v2889_v50  ;;  %v700_v27 = vmul.f32 %v549_v24, %v2894_v17 }
 0x218   :  { %3467 = vst [vmem:[#allocation67_spill] sm:$0xff] %v2914_v30  ;;  %1907 = vmatprep.subr.bf16.mxu0 %v1906_v52  ;;  %v2931_v49 = vmul.f32 %v647_v47, %v2899_v15  ;;  %v701_v23 = vmul.f32 %v551_v34, %v2904_v22  ;;  %v2988_v22 = vld [vmem:[%s3318_s2 + $0xd8] sm:$0xff] }
 0x219   :  { %1909 = vmatpush1.bf16.msra.mxu0 %v1908_v25  ;;  %v2964_v25 = vld [vmem:[%s3318_s2 + $0xc8] sm:$0xff]  ;;  %3477 = vst [vmem:[#allocation77_spill] sm:$0xff] %v2988_v22 }
 0x21a   :  { %v651_v52 = vpop.f32.mrb[22].mxu1  ;;  %v555_v50 = vpop.f32.mrb[24].mxu0  ;;  %3473 = vst [vmem:[#allocation73_spill] sm:$0xff] %v2964_v25 }
 0x21b   :  { %v2935_v11 = vmul.f32 %v651_v52, %v2909_v13  ;;  %v653_v9 = vpop.f32.mrb[23].mxu1  ;;  %v702_v7 = vmul.f32 %v555_v50, %v2914_v30  ;;  %v557_v24 = vpop.f32.mrb[25].mxu0  ;;  %v2949_v52 = vld [vmem:[%s3318_s2 + $0x1c0] sm:$0xff]  ;;  %v2982_v13 = vld [vmem:[%s3318_s2 + $0x1d8] sm:$0xff] }
 0x21c   :  { %v2939_v17 = vmul.f32 %v653_v9, %v2922_v21  ;;  %v703_v5 = vmul.f32 %v557_v24, %v2928_v42  ;;  %3470 = vst [vmem:[#allocation70_spill] sm:$0xff] %v2949_v52  ;;  %v2954_v9 = vld [vmem:[%s3318_s2 + $0xc0] sm:$0xff]  ;;  %3476 = vst [vmem:[#allocation76_spill] sm:$0xff] %v2982_v13 }
 0x21d   :  { %v1912_v47 = vpack.c.bf16 %v702_v7, %v700_v27  ;;  %3471 = vst [vmem:[#allocation71_spill] sm:$0xff] %v2954_v9  ;;  %v2959_v7 = vld [vmem:[%s3318_s2 + $0x1c8] sm:$0xff] }
 0x21e   :  { %v657_v15 = vpop.f32.mrb[24].mxu1  ;;  %v1910_v50 = vpack.c.bf16 %v703_v5, %v701_v23  ;;  %v561_v24 = vpop.f32.mrb[26].mxu0  ;;  %3472 = vst [vmem:[#allocation72_spill] sm:$0xff] %v2959_v7  ;;  %v2969_v5 = vld [vmem:[%s3318_s2 + $0x1d0] sm:$0xff] }
 0x21f   :  { %v659_v27 = vpop.f32.mrb[25].mxu1  ;;  %v563_v34 = vpop.f32.mrb[27].mxu0  ;;  %3474 = vst [vmem:[#allocation74_spill] sm:$0xff] %v2969_v5  ;;  %v2974_v23 = vld [vmem:[%s3318_s2 + $0xd0] sm:$0xff]  ;;  %v2977_v21 = vmul.f32 %v657_v15, %v2949_v52  ;;  %v704_v42 = vmul.f32 %v561_v24, %v2954_v9 }
 0x220   :  { %3475 = vst [vmem:[#allocation75_spill] sm:$0xff] %v2974_v23  ;;  %1911 = vmatprep.subr.bf16.mxu0 %v1910_v50  ;;  %v2991_v30 = vmul.f32 %v659_v27, %v2959_v7  ;;  %v705_v15 = vmul.f32 %v563_v34, %v2964_v25 }
 0x221   :  { %1913 = vmatpush1.bf16.msra.mxu0 %v1912_v47 }
 0x222   :  { %v663_v50 = vpop.f32.mrb[26].mxu1  ;;  %v567_v52 = vpop.f32.mrb[28].mxu0 }
 0x223   :  { %v2995_v3 = vmul.f32 %v663_v50, %v2969_v5  ;;  %v665_v0 = vpop.f32.mrb[27].mxu1  ;;  %v706_v62 = vmul.f32 %v567_v52, %v2974_v23  ;;  %v569_v24 = vpop.f32.mrb[29].mxu0  ;;  %v3009_v50 = vld [vmem:[%s3318_s2 + $0xe0] sm:$0xff]  ;;  %v3041_v5 = vld [vmem:[%s3318_s2 + $0xf8] sm:$0xff] }
 0x224   :  { %v2999_v9 = vmul.f32 %v665_v0, %v2982_v13  ;;  %v707_v60 = vmul.f32 %v569_v24, %v2988_v22  ;;  %3478 = vst [vmem:[#allocation78_spill] sm:$0xff] %v3009_v50  ;;  %v3014_v0 = vld [vmem:[%s3318_s2 + $0x1e0] sm:$0xff]  ;;  %v3046_v22 = vld [vmem:[%s3318_s2 + $0x1f8] sm:$0xff] }
 0x225   :  { %v1916_v27 = vpack.c.bf16 %v706_v62, %v704_v42  ;;  %3479 = vst [vmem:[#allocation79_spill] sm:$0xff] %v3014_v0  ;;  %v3019_v62 = vld [vmem:[%s3318_s2 + $0xe8] sm:$0xff] }
 0x226   :  { %v1946_v34 = vpack.c.bf16 %v2999_v9, %v2991_v30  ;;  %v1914_v7 = vpack.c.bf16 %v707_v60, %v705_v15  ;;  %v573_v52 = vpop.f32.mrb[30].mxu0  ;;  %v669_v24 = vpop.f32.mrb[28].mxu1  ;;  %v3024_v60 = vld [vmem:[%s3318_s2 + $0x1e8] sm:$0xff]  ;;  %v3029_v9 = vld [vmem:[%s3318_s2 + $0xf0] sm:$0xff] }
 0x227   :  { %v575_v42 = vpop.f32.mrb[31].mxu0  ;;  %v671_v30 = vpop.f32.mrb[29].mxu1  ;;  %v3034_v15 = vld [vmem:[%s3318_s2 + $0x1f0] sm:$0xff]  ;;  %v708_v47 = vmul.f32 %v573_v52, %v3009_v50  ;;  %v740_v13 = vmul.f32 %v669_v24, %v3014_v0 }
 0x228   :  { %1915 = vmatprep.subr.bf16.mxu0 %v1914_v7  ;;  %v709_v25 = vmul.f32 %v575_v42, %v3019_v62  ;;  %v741_v23 = vmul.f32 %v671_v30, %v3024_v60  ;;  %v3480_v42 = vpack.c.bf16 %v2639_v44, %v2631_v36  ;;  %v3505_v36 = vld [vmem:[#allocation11_spill] sm:$0xff]  ;;  %v3507_v44 = vld [vmem:[#allocation13_spill] sm:$0xff] }
 0x229   :  { %1917 = vmatpush1.bf16.msra.mxu0 %v1916_v27 }
 0x22a   :  { %v579_v7 = vpop.f32.mrb[32].mxu0  ;;  %v675_v58 = vpop.f32.mrb[30].mxu1 }
 0x22b   :  { %v710_v52 = vmul.f32 %v579_v7, %v3029_v9  ;;  %v742_v24 = vmul.f32 %v675_v58, %v3034_v15  ;;  %v581_v0 = vpop.f32.mrb[33].mxu0  ;;  %v677_v50 = vpop.f32.mrb[31].mxu1  ;;  %v3481_v58 = vpack.c.bf16 %v2635_v40, %v2617_v32  ;;  %v3488_v32 = vpack.c.bf16 %v2815_v28, %v2797_v37  ;;  %v3506_v40 = vld [vmem:[#allocation12_spill] sm:$0xff]  ;;  %v3510_v37 = vld [vmem:[#allocation17_spill] sm:$0xff] }
 0x22c   :  { %v711_v56 = vmul.f32 %v581_v0, %v3041_v5  ;;  %v743_v54 = vmul.f32 %v677_v50, %v3046_v22  ;;  %v3492_v28 = vpack.c.bf16 %v2935_v11, %v2917_v35  ;;  %v3502_v11 = vld [vmem:[#allocation8_spill] sm:$0xff] }
 0x22d   :  { %v1920_v20 = vpack.c.bf16 %v710_v52, %v708_v47  ;;  %v1952_v18 = vpack.c.bf16 %v742_v24, %v740_v13  ;;  %v3482_v47 = vpack.c.bf16 %v2699_v33, %v2691_v45  ;;  %v3490_v33 = vpack.c.bf16 %v2875_v19, %v2857_v2  ;;  %v1271_v19 = vld [vmem:[%s3319_s5] sm:$0xff]  ;;  %v3515_v13 = vld [vmem:[#allocation25_spill] sm:$0xff] }
 0x22e   :  { %v1918_v16 = vpack.c.bf16 %v711_v56, %v709_v25  ;;  %v1950_v27 = vpack.c.bf16 %v743_v54, %v741_v23  ;;  %v3483_v54 = vmov 0.0   ;;  %v3484_v56 = vpack.c.bf16 %v2695_v46, %v2677_v39  ;;  %v3508_v46 = vld [vmem:[#allocation14_spill] sm:$0xff]  ;;  %v3511_v39 = vld [vmem:[#allocation19_spill] sm:$0xff]  ;;  %v3516_v23 = vld [vmem:[#allocation29_spill] sm:$0xff] }
 0x230   :  { %1919 = vmatprep.subr.bf16.mxu0 %v1918_v16  ;;  %v3485_v16 = vpack.c.bf16 %v2759_v48, %v2751_v43  ;;  %v1274_v43 = vld [vmem:[%s3319_s5 + $0x18] sm:$0xff]  ;;  %v1273_v48 = vld [vmem:[%s3319_s5 + $0x10] sm:$0xff] }
 0x231   :  { %1921 = vmatpush1.bf16.msra.mxu0 %v1920_v20  ;;  %v3486_v20 = vpack.c.bf16 %v2755_v29, %v2737_v41  ;;  %v3509_v29 = vld [vmem:[#allocation15_spill] sm:$0xff]  ;;  %v3512_v41 = vld [vmem:[#allocation21_spill] sm:$0xff] }
 0x232   :  { %1923 = vmatprep.subr.bf16.mxu0 %v3480_v42  ;;  %v3517_v42 = vld [vmem:[#allocation31_spill] sm:$0xff] }
 0x233   :  { %v879_v30 = vpop.f32.mrb[32].mxu1 }
 0x234   :  { %v881_v7 = vpop.f32.mrb[33].mxu1 }
 0x235   :  { %884 = vmatprep.subr.mxu1 %v881_v7  ;;  %1925 = vmatpush1.bf16.msra.mxu0 %v3481_v58  ;;  %v3518_v7 = vld [vmem:[#allocation35_spill] sm:$0xff] }
 0x236   :  { %885 = vmatpush1.msra.mxu1 %v879_v30  ;;  %1927 = vmatprep.subr.bf16.mxu0 %v3482_v47 }
 0x237   :  { %1686 = vmatmul.mubr.msk.f32.vlgmr.msra.gmra.mrb[34].mxu1 %vm156_vm0, %v2281_v53  ;;  %v3487_v53 = vpack.c.bf16 %v2819_v38, %v2811_v51  ;;  %v1719_v51 = vld [vmem:[%s3319_s5 + $0x28] sm:$0xff]  ;;  %v1721_v38 = vld [vmem:[%s3319_s5 + $0x38] sm:$0xff] }
 0x238   :  { %954 = vmatprep.mubr.f32.mxu1 %v3483_v54 }
 0x239   :  { %1929 = vmatpush1.bf16.msra.mxu0 %v3484_v56 }
 0x23a   :  { %1931 = vmatprep.subr.bf16.mxu0 %v3485_v16  ;;  %v3520_v16 = vld [vmem:[#allocation37_spill] sm:$0xff] }
 0x23b   :  { %1687 = vmatmul.mubr.msk.f32.gmra.mrb[36].mxu1 %vm156_vm0, %v2297_v55  ;;  %v3489_v55 = vpack.c.bf16 %v2879_v31, %v2871_v26  ;;  %v3513_v26 = vld [vmem:[#allocation23_spill] sm:$0xff] }
 0x23c   :  { %960 = vmatprep.mubr.f32.mxu1 %v3483_v54 }
 0x23d   :  { %1933 = vmatpush1.bf16.msra.mxu0 %v3486_v20 }
 0x23e   :  { %1935 = vmatprep.subr.bf16.mxu0 %v3487_v53 }
 0x23f   :  { %1688 = vmatmul.mubr.msk.f32.gmra.mrb[38].mxu1 %vm156_vm0, %v2316_v57  ;;  %v3491_v57 = vpack.c.bf16 %v2939_v17, %v2931_v49 }
 0x240   :  { %966 = vmatprep.mubr.f32.mxu1 %v3483_v54 }
 0x241   :  { %1937 = vmatpush1.bf16.msra.mxu0 %v3488_v32 }
 0x242   :  { %1939 = vmatprep.subr.bf16.mxu0 %v3489_v55 }
 0x243   :  { %1689 = vmatmul.mubr.msk.f32.gmra.mrb[40].mxu1 %vm156_vm0, %v2338_v59  ;;  %v3493_v59 = vpack.c.bf16 %v2995_v3, %v2977_v21  ;;  %v3497_v3 = vld [vmem:[#allocation3_spill] sm:$0xff] }
 0x244   :  { %972 = vmatprep.mubr.f32.mxu1 %v3483_v54  ;;  %v3514_v21 = vld [vmem:[#allocation27_spill] sm:$0xff] }
 0x245   :  { %1941 = vmatpush1.bf16.msra.mxu0 %v3490_v33 }
 0x246   :  { %1943 = vmatprep.subr.bf16.mxu0 %v3491_v57 }
 0x247   :  { %1690 = vmatmul.mubr.msk.f32.gmra.mrb[42].mxu1 %vm156_vm0, %v2354_v61  ;;  %v3494_v61 = vld [vmem:[#allocation16_spill] sm:$0xff] }
 0x248   :  { %978 = vmatprep.mubr.f32.mxu1 %v3483_v54 }
 0x249   :  { %1945 = vmatpush1.bf16.msra.mxu0 %v3492_v28  ;;  %v3521_v28 = vld [vmem:[#allocation39_spill] sm:$0xff] }
 0x24a   :  { %1947 = vmatprep.subr.bf16.mxu0 %v1946_v34 }
 0x24b   :  { %1691 = vmatmul.mubr.msk.f32.gmra.mrb[44].mxu1 %vm156_vm0, %v2376_v63  ;;  %v3495_v63 = vld [vmem:[#allocation18_spill] sm:$0xff] }
 0x24c   :  { %984 = vmatprep.mubr.f32.mxu1 %v3483_v54 }
 0x24d   :  { %1949 = vmatpush1.bf16.msra.mxu0 %v3493_v59 }
 0x24e   :  { %1951 = vmatprep.subr.bf16.mxu0 %v1950_v27 }
 0x24f   :  { %1692 = vmatmul.mubr.msk.f32.gmra.mrb[46].mxu1 %vm156_vm0, %v2392_v1  ;;  %v3496_v1 = vld [vmem:[#allocation20_spill] sm:$0xff] }
 0x250   :  { %990 = vmatprep.mubr.f32.mxu1 %v3483_v54 }
 0x251   :  { %1953 = vmatpush1.bf16.msra.mxu0 %v1952_v18  ;;  %v1272_v18 = vld [vmem:[%s3319_s5 + $0x8] sm:$0xff] }
 0x252   :  { %1414 = vmatprep.mubr.f32.mxu0 %v1272_v18 }
 0x253   :  { %1693 = vmatmul.mubr.msk.f32.gmra.mrb[48].mxu1 %vm156_vm0, %v2414_v4  ;;  %v3498_v4 = vld [vmem:[#allocation4_spill] sm:$0xff] }
 0x254   :  { %996 = vmatprep.mubr.f32.mxu1 %v3483_v54  ;;  %1415 = vmatmul.mubr.f32.vlgmr.msra.gmra.mrb[34].mxu0 %v1271_v19  ;;  %v3525_v19 = vld [vmem:[#allocation47_spill] sm:$0xff] }
 0x255   :  { %1420 = vmatprep.mubr.f32.mxu0 %v1274_v43 }
 0x257   :  { %1694 = vmatmul.mubr.msk.f32.gmra.mrb[50].mxu1 %vm156_vm0, %v2430_v6  ;;  %v3499_v6 = vld [vmem:[#allocation5_spill] sm:$0xff] }
 0x258   :  { %1002 = vmatprep.mubr.f32.mxu1 %v3483_v54  ;;  %1421 = vmatmul.mubr.f32.gmra.mrb[36].mxu0 %v1273_v48 }
 0x259   :  { %1565 = vmatprep.mubr.f32.mxu0 %v1719_v51 }
 0x25b   :  { %1695 = vmatmul.mubr.msk.f32.gmra.mrb[52].mxu1 %vm156_vm0, %v2452_v8  ;;  %v3500_v8 = vld [vmem:[#allocation6_spill] sm:$0xff] }
 0x25c   :  { %1008 = vmatprep.mubr.f32.mxu1 %v3483_v54 }
 0x25f   :  { %1696 = vmatmul.mubr.msk.f32.gmra.mrb[54].mxu1 %vm156_vm0, %v2468_v10  ;;  %v3501_v10 = vld [vmem:[#allocation7_spill] sm:$0xff] }
 0x260   :  { %1014 = vmatprep.mubr.f32.mxu1 %v3483_v54 }
 0x263   :  { %1697 = vmatmul.mubr.msk.f32.gmra.mrb[56].mxu1 %vm156_vm0, %v2490_v12  ;;  %v3503_v12 = vld [vmem:[#allocation9_spill] sm:$0xff] }
 0x264   :  { %1020 = vmatprep.mubr.f32.mxu1 %v3483_v54 }
 0x267   :  { %1698 = vmatmul.mubr.msk.f32.gmra.mrb[58].mxu1 %vm156_vm0, %v2506_v14  ;;  %v3504_v14 = vld [vmem:[#allocation10_spill] sm:$0xff] }
 0x268   :  { %1026 = vmatprep.mubr.f32.mxu1 %v3483_v54 }
 0x26b   :  { %1699 = vmatmul.mubr.msk.f32.gmra.mrb[60].mxu1 %vm156_vm0, %v3494_v61  ;;  %v3522_v61 = vld [vmem:[#allocation43_spill] sm:$0xff] }
 0x26c   :  { %1032 = vmatprep.mubr.f32.mxu1 %v3483_v54 }
 0x26f   :  { %1700 = vmatmul.mubr.msk.f32.gmra.mrb[62].mxu1 %vm156_vm0, %v3495_v63 }
 0x270   :  { %1038 = vmatprep.mubr.f32.mxu1 %v3483_v54 }
 0x273   :  { %1701 = vmatmul.mubr.msk.f32.gmra.mrb[64].mxu1 %vm156_vm0, %v3496_v1 }
 0x274   :  { %1044 = vmatprep.mubr.f32.mxu1 %v3483_v54 }
 0x277   :  { %1702 = vmatmul.mubr.msk.f32.gmra.mrb[66].mxu1 %vm156_vm0, %v3497_v3  ;;  %v3523_v3 = vld [vmem:[#allocation41_spill] sm:$0xff] }
 0x278   :  { %1050 = vmatprep.mubr.f32.mxu1 %v3483_v54 }
 0x27b   :  { %1703 = vmatmul.mubr.msk.f32.gmra.mrb[68].mxu1 %vm156_vm0, %v3498_v4 }
 0x27c   :  { %1056 = vmatprep.mubr.f32.mxu1 %v3483_v54 }
 0x27f   :  { %1704 = vmatmul.mubr.msk.f32.gmra.mrb[70].mxu1 %vm156_vm0, %v3499_v6  ;;  %v3524_v6 = vld [vmem:[#allocation45_spill] sm:$0xff] }
 0x280   :  { %1062 = vmatprep.mubr.f32.mxu1 %v3483_v54 }
 0x283   :  { %1705 = vmatmul.mubr.msk.f32.gmra.mrb[72].mxu1 %vm156_vm0, %v3500_v8 }
 0x284   :  { %1068 = vmatprep.mubr.f32.mxu1 %v3483_v54 }
 0x287   :  { %1706 = vmatmul.mubr.msk.f32.gmra.mrb[74].mxu1 %vm156_vm0, %v3501_v10 }
 0x288   :  { %1074 = vmatprep.mubr.f32.mxu1 %v3483_v54 }
 0x28b   :  { %1707 = vmatmul.mubr.msk.f32.gmra.mrb[76].mxu1 %vm156_vm0, %v3502_v11 }
 0x28c   :  { %1080 = vmatprep.mubr.f32.mxu1 %v3483_v54 }
 0x28f   :  { %1708 = vmatmul.mubr.msk.f32.gmra.mrb[78].mxu1 %vm156_vm0, %v3503_v12 }
 0x290   :  { %1086 = vmatprep.mubr.f32.mxu1 %v3483_v54 }
 0x293   :  { %1709 = vmatmul.mubr.msk.f32.gmra.mrb[80].mxu1 %vm156_vm0, %v3504_v14 }
 0x294   :  { %1092 = vmatprep.mubr.f32.mxu1 %v3483_v54 }
 0x297   :  { %1710 = vmatmul.mubr.msk.f32.gmra.mrb[82].mxu1 %vm156_vm0, %v3505_v36 }
 0x298   :  { %1098 = vmatprep.mubr.f32.mxu1 %v3483_v54 }
 0x29b   :  { %1711 = vmatmul.mubr.msk.f32.gmra.mrb[84].mxu1 %vm156_vm0, %v3506_v40  ;;  %v3526_v40 = vld [vmem:[#allocation51_spill] sm:$0xff] }
 0x29c   :  { %1104 = vmatprep.mubr.f32.mxu1 %v3483_v54 }
 0x29f   :  { %1712 = vmatmul.mubr.msk.f32.gmra.mrb[86].mxu1 %vm156_vm0, %v3507_v44 }
 0x2a0   :  { %1110 = vmatprep.mubr.f32.mxu1 %v3483_v54 }
 0x2a3   :  { %1713 = vmatmul.mubr.msk.f32.gmra.mrb[88].mxu1 %vm156_vm0, %v3508_v46 }
 0x2a4   :  { %1116 = vmatprep.mubr.f32.mxu1 %v3483_v54 }
 0x2a7   :  { %1714 = vmatmul.mubr.msk.f32.gmra.mrb[90].mxu1 %vm156_vm0, %v3509_v29  ;;  %v3527_v29 = vld [vmem:[#allocation49_spill] sm:$0xff] }
 0x2a8   :  { %1122 = vmatprep.mubr.f32.mxu1 %v3483_v54 }
 0x2ab   :  { %1715 = vmatmul.mubr.msk.f32.gmra.mrb[92].mxu1 %vm156_vm0, %v3510_v37 }
 0x2ac   :  { %1128 = vmatprep.mubr.f32.mxu1 %v3483_v54 }
 0x2af   :  { %1716 = vmatmul.mubr.msk.f32.gmra.mrb[94].mxu1 %vm156_vm0, %v3511_v39  ;;  %v3528_v39 = vld [vmem:[#allocation53_spill] sm:$0xff] }
 0x2b0   :  { %1134 = vmatprep.mubr.f32.mxu1 %v3483_v54  ;;  %v3519_v54 = vld [vmem:[#allocation33_spill] sm:$0xff] }
 0x2b3   :  { %1717 = vmatmul.mubr.msk.f32.gmra.mrb[96].mxu1 %vm156_vm0, %v3512_v41 }
 0x2b4   :  { %1571 = vmatprep.mubr.f32.mxu1 %v1721_v38  ;;  %v3529_v38 = vld [vmem:[#allocation55_spill] sm:$0xff] }
 0x30a   :  { %v950_v45 = vpop.f32.mrb[34].mxu1 }
 0x30b   :  { %v952_v2 = vpop.f32.mrb[35].mxu1  ;;  %v1141_v31 = vmul.f32 %v950_v45, %v3513_v26  ;;  %v3530_v26 = vld [vmem:[#allocation59_spill] sm:$0xff] }
 0x30c   :  { %v1142_v25 = vmul.f32 %v952_v2, %v3515_v13  ;;  %v3532_v13 = vld [vmem:[#allocation61_spill] sm:$0xff] }
 0x30e   :  { %v956_v35 = vpop.f32.mrb[36].mxu1 }
 0x30f   :  { %v1143_v49 = vmul.f32 %v956_v35, %v3514_v21  ;;  %v958_v17 = vpop.f32.mrb[37].mxu1 }
 0x310   :  { %v1144_v34 = vmul.f32 %v958_v17, %v3516_v23 }
 0x311   :  { %v1956_v50 = vpack.c.bf16 %v1143_v49, %v1141_v31  ;;  %v3531_v49 = vld [vmem:[#allocation57_spill] sm:$0xff] }
 0x312   :  { %v1954_v0 = vpack.c.bf16 %v1144_v34, %v1142_v25  ;;  %v962_v52 = vpop.f32.mrb[38].mxu1 }
 0x313   :  { %v964_v24 = vpop.f32.mrb[39].mxu1  ;;  %v1145_v30 = vmul.f32 %v962_v52, %v3517_v42  ;;  %v3534_v42 = vld [vmem:[#allocation67_spill] sm:$0xff] }
 0x314   :  { %1955 = vmatprep.subr.bf16.mxu0 %v1954_v0  ;;  %2020 = vmatprep.subr.bf16.mxu1 %v1954_v0  ;;  %v1146_v56 = vmul.f32 %v964_v24, %v3519_v54  ;;  %v3533_v24 = vld [vmem:[#allocation63_spill] sm:$0xff]  ;;  %v3536_v54 = vld [vmem:[#allocation69_spill] sm:$0xff] }
 0x315   :  { %1957 = vmatpush1.bf16.msra.mxu0 %v1956_v50  ;;  %2036 = vmatpush1.bf16.msra.mxu1 %v1956_v50 }
 0x316   :  { %v968_v27 = vpop.f32.mrb[40].mxu1 }
 0x317   :  { %v1147_v58 = vmul.f32 %v968_v27, %v3518_v7  ;;  %v970_v47 = vpop.f32.mrb[41].mxu1 }
 0x318   :  { %v1148_v20 = vmul.f32 %v970_v47, %v3520_v16 }
 0x319   :  { %v1960_v53 = vpack.c.bf16 %v1147_v58, %v1145_v30  ;;  %v3535_v58 = vld [vmem:[#allocation65_spill] sm:$0xff] }
 0x31a   :  { %v1958_v32 = vpack.c.bf16 %v1148_v20, %v1146_v56  ;;  %v974_v55 = vpop.f32.mrb[42].mxu1 }
 0x31b   :  { %v976_v33 = vpop.f32.mrb[43].mxu1  ;;  %v1149_v59 = vmul.f32 %v974_v55, %v3521_v28  ;;  %v3538_v28 = vld [vmem:[#allocation75_spill] sm:$0xff] }
 0x31c   :  { %1959 = vmatprep.subr.bf16.mxu0 %v1958_v32  ;;  %2021 = vmatprep.subr.bf16.mxu1 %v1958_v32  ;;  %v1150_v4 = vmul.f32 %v976_v33, %v3523_v3  ;;  %v3537_v33 = vld [vmem:[#allocation71_spill] sm:$0xff]  ;;  %v3540_v3 = vld [vmem:[#allocation77_spill] sm:$0xff] }
 0x31d   :  { %1961 = vmatpush1.bf16.msra.mxu0 %v1960_v53  ;;  %2037 = vmatpush1.bf16.msra.mxu1 %v1960_v53 }
 0x31e   :  { %v980_v57 = vpop.f32.mrb[44].mxu1 }
 0x31f   :  { %v1151_v63 = vmul.f32 %v980_v57, %v3522_v61  ;;  %v982_v1 = vpop.f32.mrb[45].mxu1 }
 0x320   :  { %v1152_v8 = vmul.f32 %v982_v1, %v3524_v6 }
 0x321   :  { %v1964_v10 = vpack.c.bf16 %v1151_v63, %v1149_v59  ;;  %v3539_v63 = vld [vmem:[#allocation73_spill] sm:$0xff] }
 0x322   :  { %v1962_v11 = vpack.c.bf16 %v1152_v8, %v1150_v4  ;;  %v986_v12 = vpop.f32.mrb[46].mxu1 }
 0x323   :  { %v988_v14 = vpop.f32.mrb[47].mxu1  ;;  %v1153_v36 = vmul.f32 %v986_v12, %v3525_v19 }
 0x324   :  { %1963 = vmatprep.subr.bf16.mxu0 %v1962_v11  ;;  %2022 = vmatprep.subr.bf16.mxu1 %v1962_v11  ;;  %v1154_v37 = vmul.f32 %v988_v14, %v3527_v29  ;;  %v3541_v14 = vld [vmem:[#allocation78_spill] sm:$0xff] }
 0x325   :  { %1965 = vmatpush1.bf16.msra.mxu0 %v1964_v10  ;;  %2038 = vmatpush1.bf16.msra.mxu1 %v1964_v10 }
 0x326   :  { %v992_v18 = vpop.f32.mrb[48].mxu1 }
 0x327   :  { %v1155_v44 = vmul.f32 %v992_v18, %v3526_v40  ;;  %v994_v46 = vpop.f32.mrb[49].mxu1 }
 0x328   :  { %v1156_v41 = vmul.f32 %v994_v46, %v3528_v39 }
 0x329   :  { %v1968_v43 = vpack.c.bf16 %v1155_v44, %v1153_v36 }
 0x32a   :  { %v1966_v45 = vpack.c.bf16 %v1156_v41, %v1154_v37  ;;  %v998_v48 = vpop.f32.mrb[50].mxu1 }
 0x32b   :  { %v1000_v2 = vpop.f32.mrb[51].mxu1  ;;  %v1157_v35 = vmul.f32 %v998_v48, %v3529_v38  ;;  %v3543_v48 = vld [vmem:[#allocation26_spill] sm:$0xff] }
 0x32c   :  { %1967 = vmatprep.subr.bf16.mxu0 %v1966_v45  ;;  %2023 = vmatprep.subr.bf16.mxu1 %v1966_v45  ;;  %v1158_v17 = vmul.f32 %v1000_v2, %v3531_v49 }
 0x32d   :  { %1969 = vmatpush1.bf16.msra.mxu0 %v1968_v43  ;;  %2039 = vmatpush1.bf16.msra.mxu1 %v1968_v43  ;;  %v3542_v43 = vld [vmem:[#allocation22_spill] sm:$0xff] }
 0x32e   :  { %v1004_v51 = vpop.f32.mrb[52].mxu1 }
 0x32f   :  { %v1159_v31 = vmul.f32 %v1004_v51, %v3530_v26  ;;  %v1006_v21 = vpop.f32.mrb[53].mxu1 }
 0x330   :  { %v1160_v25 = vmul.f32 %v1006_v21, %v3532_v13 }
 0x331   :  { %v1972_v23 = vpack.c.bf16 %v1159_v31, %v1157_v35  ;;  %v3545_v35 = vld [vmem:[#allocation28_spill] sm:$0xff] }
 0x332   :  { %v1970_v34 = vpack.c.bf16 %v1160_v25, %v1158_v17  ;;  %v1010_v50 = vpop.f32.mrb[54].mxu1  ;;  %v3546_v17 = vld [vmem:[#allocation30_spill] sm:$0xff] }
 0x333   :  { %v1012_v0 = vpop.f32.mrb[55].mxu1  ;;  %v1161_v27 = vmul.f32 %v1010_v50, %v3533_v24  ;;  %v3547_v25 = vld [vmem:[#allocation34_spill] sm:$0xff]  ;;  %v3548_v50 = vld [vmem:[#allocation32_spill] sm:$0xff] }
 0x334   :  { %1971 = vmatprep.subr.bf16.mxu0 %v1970_v34  ;;  %2024 = vmatprep.subr.bf16.mxu1 %v1970_v34  ;;  %v1162_v47 = vmul.f32 %v1012_v0, %v3535_v58 }
 0x335   :  { %1973 = vmatpush1.bf16.msra.mxu0 %v1972_v23  ;;  %2040 = vmatpush1.bf16.msra.mxu1 %v1972_v23 }
 0x336   :  { %v1016_v52 = vpop.f32.mrb[56].mxu1 }
 0x337   :  { %v1163_v30 = vmul.f32 %v1016_v52, %v3534_v42  ;;  %v1018_v7 = vpop.f32.mrb[57].mxu1  ;;  %v3549_v52 = vld [vmem:[#allocation36_spill] sm:$0xff]  ;;  %v1340_v42 = vlaneseq }
 0x338   :  { %v1164_v56 = vmul.f32 %v1018_v7, %v3536_v54 }
 0x339   :  { %v1976_v16 = vpack.c.bf16 %v1163_v30, %v1161_v27 }
 0x33a   :  { %v1974_v20 = vpack.c.bf16 %v1164_v56, %v1162_v47  ;;  %v1022_v53 = vpop.f32.mrb[58].mxu1  ;;  %v1341_v47 = vshrl.u32 %v1340_v42, 7  ;;  %v3550_v56 = vld [vmem:[#allocation38_spill] sm:$0xff] }
 0x33b   :  { %v1024_v32 = vpop.f32.mrb[59].mxu1  ;;  %v1165_v57 = vmul.f32 %v1022_v53, %v3537_v33 }
 0x33c   :  { %1975 = vmatprep.subr.bf16.mxu0 %v1974_v20  ;;  %2025 = vmatprep.subr.bf16.mxu1 %v1974_v20  ;;  %v1166_v1 = vmul.f32 %v1024_v32, %v3539_v63  ;;  %v3551_v20 = vld [vmem:[#allocation42_spill] sm:$0xff] }
 0x33d   :  { %1977 = vmatpush1.bf16.msra.mxu0 %v1976_v16  ;;  %2041 = vmatpush1.bf16.msra.mxu1 %v1976_v16 }
 0x33e   :  { %v1028_v55 = vpop.f32.mrb[60].mxu1 }
 0x33f   :  { %v1167_v59 = vmul.f32 %v1028_v55, %v3538_v28  ;;  %v1030_v61 = vpop.f32.mrb[61].mxu1  ;;  %v3552_v55 = vld [vmem:[#allocation40_spill] sm:$0xff] }
 0x340   :  { %v1168_v4 = vmul.f32 %v1030_v61, %v3540_v3  ;;  %v1342_v61 = vsub.s32 0, %v1341_v47  ;;  %v1270_v3 = vld [vmem:[%s3320_s3] sm:$0x3] }
 0x341   :  { %v1980_v6 = vpack.c.bf16 %v1167_v59, %v1165_v57  ;;  %v3553_v57 = vld [vmem:[#allocation44_spill] sm:$0xff] }
 0x342   :  { %v1978_v8 = vpack.c.bf16 %v1168_v4, %v1166_v1  ;;  %v1034_v10 = vpop.f32.mrb[62].mxu1  ;;  %v1346_v4 = vsub.s32 1, %v1341_v47 }
 0x343   :  { %v1036_v11 = vpop.f32.mrb[63].mxu1  ;;  %v1169_v18 = vmul.f32 %v1034_v10, %v3541_v14 }
 0x344   :  { %1979 = vmatprep.subr.bf16.mxu0 %v1978_v8  ;;  %2026 = vmatprep.subr.bf16.mxu1 %v1978_v8  ;;  %v1170_v40 = vmul.f32 %v1036_v11, %v3019_v62  ;;  %v3253_v8 = vrot.slane %v1270_v3, %v1342_v61  ;;  %v3255_v11 = vrot.slane %v1270_v3, %v1346_v4 }
 0x345   :  { %1981 = vmatpush1.bf16.msra.mxu0 %v1980_v6  ;;  %2042 = vmatpush1.bf16.msra.mxu1 %v1980_v6 }
 0x346   :  { %v1040_v12 = vpop.f32.mrb[64].mxu1 }
 0x347   :  { %v1171_v19 = vmul.f32 %v1040_v12, %v3029_v9  ;;  %v1042_v36 = vpop.f32.mrb[65].mxu1  ;;  %v3544_v9 = vld [vmem:[#allocation24_spill] sm:$0xff]  ;;  %v3554_v12 = vld [vmem:[#allocation46_spill] sm:$0xff] }
 0x348   :  { %v1172_v44 = vmul.f32 %v1042_v36, %v3041_v5 }
 0x349   :  { %v1984_v46 = vpack.c.bf16 %v1171_v19, %v1169_v18  ;;  %v3555_v18 = vld [vmem:[#allocation50_spill] sm:$0xff] }
 0x34a   :  { %v1982_v29 = vpack.c.bf16 %v1172_v44, %v1170_v40  ;;  %v1046_v37 = vpop.f32.mrb[66].mxu1  ;;  %v3556_v40 = vld [vmem:[#allocation48_spill] sm:$0xff] }
 0x34b   :  { %v1048_v39 = vpop.f32.mrb[67].mxu1  ;;  %v1173_v45 = vmul.f32 %v1046_v37, %v3542_v43  ;;  %v1416_v37 = vpop.f32.mrb[34].mxu0 }
 0x34c   :  { %1983 = vmatprep.subr.bf16.mxu0 %v1982_v29  ;;  %2027 = vmatprep.subr.bf16.mxu1 %v1982_v29  ;;  %v1174_v38 = vmul.f32 %v1048_v39, %v3544_v9  ;;  %v1418_v43 = vpop.f32.mrb[35].mxu0 }
 0x34d   :  { %1985 = vmatpush1.bf16.msra.mxu0 %v1984_v46  ;;  %2043 = vmatpush1.bf16.msra.mxu1 %v1984_v46  ;;  %v3557_v46 = vld [vmem:[#allocation52_spill] sm:$0xff] }
 0x34e   :  { %v1052_v41 = vpop.f32.mrb[68].mxu1 }
 0x34f   :  { %v1175_v2 = vmul.f32 %v1052_v41, %v3543_v48  ;;  %v1054_v51 = vpop.f32.mrb[69].mxu1  ;;  %v1417_v41 = vadd.f32 %v1416_v37, %v3253_v8  ;;  %v1718_v37 = vld [vmem:[%s3319_s5 + $0x20] sm:$0xff] }
 0x350   :  { %v1176_v62 = vmul.f32 %v1054_v51, %v3545_v35 }
 0x351   :  { %v1988_v26 = vpack.c.bf16 %v1175_v2, %v1173_v45  ;;  %v1419_v2 = vadd.f32 %v1418_v43, %v3255_v11  ;;  %1427 = vst [vmem:[%s3321_s6] sm:$0xff] %v1417_v41 }
 0x352   :  { %v1986_v5 = vpack.c.bf16 %v1176_v62, %v1174_v38  ;;  %v1058_v31 = vpop.f32.mrb[70].mxu1  ;;  %v3558_v38 = vld [vmem:[#allocation54_spill] sm:$0xff] }
 0x353   :  { %v1060_v21 = vpop.f32.mrb[71].mxu1  ;;  %v1177_v13 = vmul.f32 %v1058_v31, %v3546_v17  ;;  %1428 = vst [vmem:[%s3321_s6 + $0x8] sm:$0xff] %v1419_v2  ;;  %v3559_v62 = vld [vmem:[#allocation58_spill] sm:$0xff]  ;;  %v3560_v31 = vld [vmem:[#allocation56_spill] sm:$0xff] }
 0x354   :  { %1987 = vmatprep.subr.bf16.mxu0 %v1986_v5  ;;  %2028 = vmatprep.subr.bf16.mxu1 %v1986_v5  ;;  %v1178_v0 = vmul.f32 %v1060_v21, %v3548_v50 }
 0x355   :  { %1989 = vmatpush1.bf16.msra.mxu0 %v1988_v26  ;;  %2044 = vmatpush1.bf16.msra.mxu1 %v1988_v26 }
 0x356   :  { %v1064_v49 = vpop.f32.mrb[72].mxu1 }
 0x357   :  { %v1179_v23 = vmul.f32 %v1064_v49, %v3547_v25  ;;  %v1066_v34 = vpop.f32.mrb[73].mxu1  ;;  %v3561_v49 = vld [vmem:[#allocation60_spill] sm:$0xff] }
 0x358   :  { %v1180_v24 = vmul.f32 %v1066_v34, %v3549_v52 }
 0x359   :  { %v1992_v27 = vpack.c.bf16 %v1179_v23, %v1177_v13 }
 0x35a   :  { %v1990_v30 = vpack.c.bf16 %v1180_v24, %v1178_v0  ;;  %v1070_v7 = vpop.f32.mrb[74].mxu1  ;;  %v3562_v0 = vld [vmem:[#allocation62_spill] sm:$0xff] }
 0x35b   :  { %v1072_v58 = vpop.f32.mrb[75].mxu1  ;;  %v1181_v16 = vmul.f32 %v1070_v7, %v3550_v56  ;;  %v3563_v24 = vld [vmem:[#allocation66_spill] sm:$0xff] }
 0x35c   :  { %1991 = vmatprep.subr.bf16.mxu0 %v1990_v30  ;;  %2029 = vmatprep.subr.bf16.mxu1 %v1990_v30  ;;  %v1182_v33 = vmul.f32 %v1072_v58, %v3552_v55  ;;  %v3564_v30 = vld [vmem:[#allocation64_spill] sm:$0xff] }
 0x35d   :  { %1993 = vmatpush1.bf16.msra.mxu0 %v1992_v27  ;;  %2045 = vmatpush1.bf16.msra.mxu1 %v1992_v27  ;;  %v3565_v58 = vld [vmem:[#allocation68_spill] sm:$0xff] }
 0x35e   :  { %v1076_v54 = vpop.f32.mrb[76].mxu1 }
 0x35f   :  { %v1183_v53 = vmul.f32 %v1076_v54, %v3551_v20  ;;  %v1078_v32 = vpop.f32.mrb[77].mxu1 }
 0x360   :  { %v1184_v28 = vmul.f32 %v1078_v32, %v3553_v57  ;;  %v3566_v32 = vld [vmem:[#allocation70_spill] sm:$0xff] }
 0x361   :  { %v1996_v59 = vpack.c.bf16 %v1183_v53, %v1181_v16 }
 0x362   :  { %v1994_v63 = vpack.c.bf16 %v1184_v28, %v1182_v33  ;;  %v1082_v1 = vpop.f32.mrb[78].mxu1  ;;  %v3567_v33 = vld [vmem:[#allocation74_spill] sm:$0xff] }
 0x363   :  { %v1084_v6 = vpop.f32.mrb[79].mxu1  ;;  %v1185_v14 = vmul.f32 %v1082_v1, %v3554_v12 }
 0x364   :  { %1995 = vmatprep.subr.bf16.mxu0 %v1994_v63  ;;  %2030 = vmatprep.subr.bf16.mxu1 %v1994_v63  ;;  %v1186_v44 = vmul.f32 %v1084_v6, %v3556_v40  ;;  %v3569_v63 = vld [vmem:[#allocation76_spill] sm:$0xff] }
 0x365   :  { %1997 = vmatpush1.bf16.msra.mxu0 %v1996_v59  ;;  %2046 = vmatpush1.bf16.msra.mxu1 %v1996_v59  ;;  %v3568_v59 = vld [vmem:[#allocation72_spill] sm:$0xff] }
 0x366   :  { %v1088_v10 = vpop.f32.mrb[80].mxu1 }
 0x367   :  { %v1187_v19 = vmul.f32 %v1088_v10, %v3555_v18  ;;  %v1090_v36 = vpop.f32.mrb[81].mxu1 }
 0x368   :  { %v1188_v29 = vmul.f32 %v1090_v36, %v3557_v46 }
 0x369   :  { %v2000_v39 = vpack.c.bf16 %v1187_v19, %v1185_v14  ;;  %v3570_v14 = vld [vmem:[#allocation79_spill] sm:$0xff] }
 0x36a   :  { %v1998_v45 = vpack.c.bf16 %v1188_v29, %v1186_v44  ;;  %v1094_v48 = vpop.f32.mrb[82].mxu1 }
 0x36b   :  { %v1096_v51 = vpop.f32.mrb[83].mxu1  ;;  %v1189_v35 = vmul.f32 %v1094_v48, %v3558_v38 }
 0x36c   :  { %1999 = vmatprep.subr.bf16.mxu0 %v1998_v45  ;;  %2031 = vmatprep.subr.bf16.mxu1 %v1998_v45  ;;  %v1190_v21 = vmul.f32 %v1096_v51, %v3560_v31 }
 0x36d   :  { %2001 = vmatpush1.bf16.msra.mxu0 %v2000_v39  ;;  %2047 = vmatpush1.bf16.msra.mxu1 %v2000_v39  ;;  %v1720_v39 = vld [vmem:[%s3319_s5 + $0x30] sm:$0xff] }
 0x36e   :  { %v1100_v9 = vpop.f32.mrb[84].mxu1 }
 0x36f   :  { %v1191_v26 = vmul.f32 %v1100_v9, %v3559_v62  ;;  %v1102_v5 = vpop.f32.mrb[85].mxu1 }
 0x370   :  { %v1192_v17 = vmul.f32 %v1102_v5, %v3561_v49 }
 0x371   :  { %v2004_v13 = vpack.c.bf16 %v1191_v26, %v1189_v35 }
 0x372   :  { %v2002_v25 = vpack.c.bf16 %v1192_v17, %v1190_v21  ;;  %v1106_v23 = vpop.f32.mrb[86].mxu1 }
 0x373   :  { %v1108_v34 = vpop.f32.mrb[87].mxu1  ;;  %v1193_v52 = vmul.f32 %v1106_v23, %v3562_v0 }
 0x374   :  { %2003 = vmatprep.subr.bf16.mxu0 %v2002_v25  ;;  %2032 = vmatprep.subr.bf16.mxu1 %v2002_v25  ;;  %v1194_v7 = vmul.f32 %v1108_v34, %v3564_v30 }
 0x375   :  { %2005 = vmatpush1.bf16.msra.mxu0 %v2004_v13  ;;  %2048 = vmatpush1.bf16.msra.mxu1 %v2004_v13 }
 0x376   :  { %v1112_v50 = vpop.f32.mrb[88].mxu1 }
 0x377   :  { %v1195_v27 = vmul.f32 %v1112_v50, %v3563_v24  ;;  %v1114_v42 = vpop.f32.mrb[89].mxu1 }
 0x378   :  { %v1196_v47 = vmul.f32 %v1114_v42, %v3565_v58 }
 0x379   :  { %v2008_v54 = vpack.c.bf16 %v1195_v27, %v1193_v52 }
 0x37a   :  { %v2006_v56 = vpack.c.bf16 %v1196_v47, %v1194_v7  ;;  %v1118_v16 = vpop.f32.mrb[90].mxu1 }
 0x37b   :  { %v1120_v20 = vpop.f32.mrb[91].mxu1  ;;  %v1197_v55 = vmul.f32 %v1118_v16, %v3566_v32 }
 0x37c   :  { %2007 = vmatprep.subr.bf16.mxu0 %v2006_v56  ;;  %2033 = vmatprep.subr.bf16.mxu1 %v2006_v56  ;;  %v1198_v61 = vmul.f32 %v1120_v20, %v3568_v59 }
 0x37d   :  { %2009 = vmatpush1.bf16.msra.mxu0 %v2008_v54  ;;  %2049 = vmatpush1.bf16.msra.mxu1 %v2008_v54 }
 0x37e   :  { %v1124_v53 = vpop.f32.mrb[92].mxu1 }
 0x37f   :  { %v1199_v57 = vmul.f32 %v1124_v53, %v3567_v33  ;;  %v1126_v28 = vpop.f32.mrb[93].mxu1 }
 0x380   :  { %v1200_v1 = vmul.f32 %v1126_v28, %v3569_v63 }
 0x381   :  { %v2012_v3 = vpack.c.bf16 %v1199_v57, %v1197_v55 }
 0x382   :  { %v2010_v4 = vpack.c.bf16 %v1200_v1, %v1198_v61  ;;  %v1130_v6 = vpop.f32.mrb[94].mxu1 }
 0x383   :  { %v1132_v10 = vpop.f32.mrb[95].mxu1  ;;  %v1201_v18 = vmul.f32 %v1130_v6, %v3570_v14 }
 0x384   :  { %2011 = vmatprep.subr.bf16.mxu0 %v2010_v4  ;;  %2034 = vmatprep.subr.bf16.mxu1 %v2010_v4  ;;  %v1202_v40 = vmul.f32 %v1132_v10, %v3024_v60 }
 0x385   :  { %2013 = vmatpush1.bf16.msra.mxu0 %v2012_v3  ;;  %2050 = vmatpush1.bf16.msra.mxu1 %v2012_v3 }
 0x386   :  { %v1136_v12 = vpop.f32.mrb[96].mxu1 }
 0x387   :  { %v1203_v19 = vmul.f32 %v1136_v12, %v3034_v15  ;;  %v1138_v36 = vpop.f32.mrb[97].mxu1  ;;  %v1422_v15 = vpop.f32.mrb[36].mxu0 }
 0x388   :  { %v1204_v44 = vmul.f32 %v1138_v36, %v3046_v22  ;;  %v1423_v60 = vadd.f32 %v1422_v15, %v3253_v8  ;;  %v1424_v22 = vpop.f32.mrb[37].mxu0 }
 0x389   :  { %v2016_v46 = vpack.c.bf16 %v1203_v19, %v1201_v18  ;;  %v1425_v41 = vadd.f32 %v1424_v22, %v3255_v11 }
 0x38a   :  { %v2014_v29 = vpack.c.bf16 %v1204_v44, %v1202_v40  ;;  %1429 = vst [vmem:[%s3321_s6 + $0x10] sm:$0xff] %v1423_v60 }
 0x38b   :  { %1430 = vst [vmem:[%s3321_s6 + $0x18] sm:$0xff] %v1425_v41 }
 0x38c   :  { %2015 = vmatprep.subr.bf16.mxu0 %v2014_v29  ;;  %2035 = vmatprep.subr.bf16.mxu1 %v2014_v29 }
 0x38d   :  { %2017 = vmatpush1.bf16.msra.mxu0 %v2016_v46  ;;  %2051 = vmatpush1.bf16.msra.mxu1 %v2016_v46 }
 0x390   :  { %1566 = vmatmul.mubr.f32.vlgmr.msra.gmra.mrb[38].mxu0 %v1718_v37  ;;  %1572 = vmatmul.mubr.f32.vlgmr.msra.gmra.mrb[98].mxu1 %v1720_v39 }
 0x463   :  { %v1567_v43 = vpop.f32.mrb[38].mxu0  ;;  %v1573_v45 = vpop.f32.mrb[98].mxu1 }
 0x464   :  { %v1568_v48 = vadd.f32 %v1567_v43, %v3253_v8  ;;  %v1574_v2 = vadd.f32 %v1573_v45, %v3253_v8  ;;  %v1569_v51 = vpop.f32.mrb[39].mxu0  ;;  %v1575_v9 = vpop.f32.mrb[99].mxu1 }
 0x465   :  { %v1570_v38 = vadd.f32 %v1569_v51, %v3255_v11  ;;  %v1576_v35 = vadd.f32 %v1575_v9, %v3255_v11 }
 0x466   :  { %1722 = vst [vmem:[%s3321_s6 + $0x20] sm:$0xff] %v1568_v48  ;;  %1724 = vst [vmem:[%s3321_s6 + $0x30] sm:$0xff] %v1574_v2 }
 0x467   :  { %1723 = vst [vmem:[%s3321_s6 + $0x28] sm:$0xff] %v1570_v38  ;;  %1725 = vst [vmem:[%s3321_s6 + $0x38] sm:$0xff] %v1576_v35 }

</bundles_post_ra>
